<compile_context>
chip_gen: v7x
topology: tpu7x:2x2x1
jax: 0.10.0
libtpu: 0.0.40
codegen_flags: <defaults>
</compile_context>

<pallas_src>
import functools

import jax
import jax.numpy as jnp
from jax import lax
from jax.experimental import pallas as pl
from jax.experimental.pallas import tpu as pltpu

LN_EPS = 1e-5                      # torch.nn.LayerNorm default
VMEM_LIMIT = 32 * 1024 * 1024      # safe scoped-VMEM budget on v5e/v6e/v7x


def _compiler_params(sem):
    return pltpu.CompilerParams(dimension_semantics=sem,
                                vmem_limit_bytes=VMEM_LIMIT)


def _choose_row_tile(m):
    # Prefer 256-row tiles (good on v5e's default scoped VMEM and v6e/v7x MXU).
    for t in (256, 128, 64, 32, 16, 8):
        if m % t == 0:
            return t
    return m


def _choose_chan_tile(d):
    for t in (256, 128):
        if d % t == 0:
            return t
    return d


# ------------------------------ kernel helpers ------------------------------ #

def _layernorm(x, g, b):
    mu = jnp.mean(x, axis=-1, keepdims=True)
    var = jnp.mean(jnp.square(x - mu), axis=-1, keepdims=True)
    return (x - mu) * lax.rsqrt(var + LN_EPS) * g + b


def _silu(x):
    return x * jax.nn.sigmoid(x)


# ----------------------------- Pallas kernels ------------------------------- #

def linear_kernel(x_ref, w_ref, b_ref, o_ref):
    # x: (TM, K) @ w: (K, N) + b: (1, N)
    o_ref[...] = (jnp.dot(x_ref[...], w_ref[...],
                          preferred_element_type=jnp.float32) + b_ref[...])


def ln_in_proj_kernel(x_ref, g_ref, b_ref, wx_ref, bx_ref, wz_ref, bz_ref,
                      xo_ref, zo_ref):
    # Fused LayerNorm + in_proj (split into x-branch and gate branch z).
    xn = _layernorm(x_ref[...], g_ref[...], b_ref[...])
    xo_ref[...] = (jnp.dot(xn, wx_ref[...],
                           preferred_element_type=jnp.float32) + bx_ref[...])
    zo_ref[...] = (jnp.dot(xn, wz_ref[...],
                           preferred_element_type=jnp.float32) + bz_ref[...])


def out_proj_residual_kernel(y_ref, res_ref, w_ref, b_ref, o_ref):
    # Fused out_proj matmul + residual add.
    o_ref[...] = (res_ref[...]
                  + jnp.dot(y_ref[...], w_ref[...],
                            preferred_element_type=jnp.float32)
                  + b_ref[...])


def ln_ffn_residual_kernel(x_ref, g_ref, b_ref, w1_ref, b1_ref, w2_ref, b2_ref,
                           o_ref):
    # Fused LayerNorm + (Linear -> Swish -> Linear) + residual add.
    x = x_ref[...]
    xn = _layernorm(x, g_ref[...], b_ref[...])
    h = jnp.dot(xn, w1_ref[...], preferred_element_type=jnp.float32) + b1_ref[...]
    h = _silu(h)
    o_ref[...] = x + jnp.dot(h, w2_ref[...],
                             preferred_element_type=jnp.float32) + b2_ref[...]


def conv_xproj_kernel(x_ref, cw_ref, cb_ref, wd_ref, bd_ref, wbc_ref, bbc_ref,
                      u_ref, dt_ref, bc_ref, *, K):
    # Depthwise causal conv1d + SiLU, fused with x_proj (dt_proj already folded
    # into wd host-side).  One grid point = one batch element, full sequence.
    # x: (L, di) -> u: (L, di), dt_raw: (L, di), bc: (L, 2N)
    x = x_ref[...]
    L, di = x.shape
    w = cw_ref[...]                                   # (K, di)
    if K > 1:
        xp = jnp.concatenate([jnp.zeros((K - 1, di), x.dtype), x], axis=0)
    else:
        xp = x
    acc = xp[0:L, :] * w[0, :]
    for k in range(1, K):
        acc = acc + xp[k:k + L, :] * w[k, :]
    y = acc + cb_ref[...]
    u = _silu(y)
    u_ref[...] = u
    dt_ref[...] = (jnp.dot(u, wd_ref[...],
                           preferred_element_type=jnp.float32) + bd_ref[...])
    bc_ref[...] = (jnp.dot(u, wbc_ref[...],
                           preferred_element_type=jnp.float32) + bbc_ref[...])


def ssm_scan_kernel(u_ref, dt_ref, z_ref, bct_ref, At_ref, D_ref, o_ref, *, N):
    # Selective-scan recurrence + SiLU gate.
    # One grid point = (batch b, channel block c).
    # u/dt/z/o refs: (L, tc) with channels on lanes; bct: (2N, L); At: (N, tc);
    # D: (1, tc).  State h: (N, tc)  -> di on lanes (dense), N on sublanes.
    L = u_ref.shape[0]
    A = At_ref[...]                                   # (N, tc)
    Dv = D_ref[...]                                   # (1, tc)
    bcT = bct_ref[...]                                # (2N, L), tiny
    lane_t = lax.broadcasted_iota(jnp.int32, (1, L), 1)

    def step(t, h):
        u_t = u_ref[pl.ds(t, 1), :]                   # (1, tc)
        d_t = dt_ref[pl.ds(t, 1), :]                  # (1, tc)
        # softplus (threshold 20, as in torch.nn.functional.softplus)
        d_t = jnp.where(d_t > 20.0, d_t,
                        jnp.log(1.0 + jnp.exp(jnp.minimum(d_t, 20.0))))
        # select time column t of B/C via masked lane reduction (no transpose,
        # no dynamic lane indexing)
        mask = (lane_t == t).astype(jnp.float32)      # (1, L)
        col = jnp.sum(bcT * mask, axis=1, keepdims=True)   # (2N, 1)
        B_col = col[:N, :]                            # (N, 1)
        C_col = col[N:, :]                            # (N, 1)

        dA = jnp.exp(d_t * A)                         # (N, tc)
        h = dA * h + B_col * (d_t * u_t)              # (N, tc)
        y_t = jnp.sum(h * C_col, axis=0, keepdims=True) + Dv * u_t  # (1, tc)

        z_t = z_ref[pl.ds(t, 1), :]
        o_ref[pl.ds(t, 1), :] = y_t * (z_t * jax.nn.sigmoid(z_t))   # stream out
        return h

    h0 = jnp.zeros((N, A.shape[-1]), jnp.float32)
    lax.fori_loop(0, L, step, h0)


# ------------------------------- JAX glue ----------------------------------- #

def _row_call(kernel, row_ins, fixed_ins, out_widths):
    """Grid a kernel over the row axis M; row ins/outs tiled, fixed ins resident."""
    M = row_ins[0].shape[0]
    tm = _choose_row_tile(M)
    grid = (M // tm,)
    in_specs = ([pl.BlockSpec((tm, a.shape[1]), lambda i: (i, 0)) for a in row_ins]
                + [pl.BlockSpec(a.shape, lambda i: (0, 0)) for a in fixed_ins])
    out_specs = [pl.BlockSpec((tm, w), lambda i: (i, 0)) for w in out_widths]
    out_shape = [jax.ShapeDtypeStruct((M, w), jnp.float32) for w in out_widths]
    return pl.pallas_call(
        kernel,
        grid=grid,
        in_specs=in_specs,
        out_specs=out_specs,
        out_shape=out_shape,
        compiler_params=_compiler_params(("parallel",)),
    )(*row_ins, *fixed_ins)


def mamba_encoder_layer(x, p):
    B, L, D = x.shape
    M = B * L
    m = p["mamba"]
    K, di = m["conv_w"].shape
    N = m["A_t"].shape[0]
    twoN = 2 * N

    x2d = x.reshape(M, D)

    # 1) fused LayerNorm + in_proj (two lane-dense outputs: x-branch, gate z)
    x_in2d, z2d = _row_call(
        ln_in_proj_kernel,
        [x2d],
        [p["ln1_g"], p["ln1_b"], m["W_in_x"], m["b_in_x"], m["W_in_z"], m["b_in_z"]],
        [di, di])
    x_in = x_in2d.reshape(B, L, di)
    z = z2d.reshape(B, L, di)

    # 2) depthwise causal conv + SiLU + fused x_proj/dt_proj, gridded over batch
    seq_spec = lambda w: pl.BlockSpec((None, L, w), lambda b: (b, 0, 0))
    fix_spec = lambda a: pl.BlockSpec(a.shape, lambda b: (0, 0))
    conv_k = functools.partial(conv_xproj_kernel, K=K)
    u, dt_raw, bc = pl.pallas_call(
        conv_k,
        grid=(B,),
        in_specs=[seq_spec(di), fix_spec(m["conv_w"]), fix_spec(m["conv_b"]),
                  fix_spec(m["W_delta"]), fix_spec(m["b_delta"]),
                  fix_spec(m["W_bc"]), fix_spec(m["b_bc"])],
        out_specs=[seq_spec(di), seq_spec(di), seq_spec(twoN)],
        out_shape=[jax.ShapeDtypeStruct((B, L, di), jnp.float32),
                   jax.ShapeDtypeStruct((B, L, di), jnp.float32),
                   jax.ShapeDtypeStruct((B, L, twoN), jnp.float32)],
        compiler_params=_compiler_params(("parallel",)),
    )(x_in, m["conv_w"], m["conv_b"], m["W_delta"], m["b_delta"],
      m["W_bc"], m["b_bc"])

    # tiny (B, L, 2N) -> (B, 2N, L) swap so the scan reads B/C on sublanes;
    # this is B*L*2N floats, negligible vs the (B, L, di) activations.
    bcT = jnp.swapaxes(bc, 1, 2)

    # 3) selective scan, gridded over (batch, channel blocks) -- both parallel
    tc = _choose_chan_tile(di)
    nc = di // tc
    chan_spec = pl.BlockSpec((None, L, tc), lambda b, c: (b, 0, c))
    scan_k = functools.partial(ssm_scan_kernel, N=N)
    y = pl.pallas_call(
        scan_k,
        grid=(B, nc),
        in_specs=[chan_spec, chan_spec, chan_spec,
                  pl.BlockSpec((None, twoN, L), lambda b, c: (b, 0, 0)),
                  pl.BlockSpec((N, tc), lambda b, c: (0, c)),
                  pl.BlockSpec((1, tc), lambda b, c: (0, c))],
        out_specs=chan_spec,
        out_shape=jax.ShapeDtypeStruct((B, L, di), jnp.float32),
        compiler_params=_compiler_params(("parallel", "parallel")),
    )(u, dt_raw, z, bcT, m["A_t"], m["D"])

    # 4) out_proj fused with the first residual add
    (out1_2d,) = _row_call(
        out_proj_residual_kernel,
        [y.reshape(M, di), x2d],
        [m["W_out"], m["b_out"]],
        [D])

    # 5) fused LayerNorm + FFN + second residual add
    (out2d,) = _row_call(
        ln_ffn_residual_kernel,
        [out1_2d],
        [p["ln2_g"], p["ln2_b"], p["W1"], p["b1"], p["W2"], p["b2"]],
        [D])
    return out2d.reshape(B, L, D)


def encoder_ssm(x, params):
    B, L, _ = x.shape
    if "in_proj_w" in params:  # input_size != output_sizes[0]
        D0 = params["in_proj_w"].shape[1]
        (x2d,) = _row_call(linear_kernel,
                           [x.reshape(B * L, -1)],
                           [params["in_proj_w"], params["in_proj_b"]],
                           [D0])
        x = x2d.reshape(B, L, D0)
    for lp in params["layers"]:
        x = mamba_encoder_layer(x, lp)
    return x


# --------------------------- parameter creation ----------------------------- #

def init_params(key, input_size, num_layers, output_sizes, d_ffn, mamba_config):
    output_sizes = list(output_sizes)
    if len(output_sizes) < num_layers:
        output_sizes = output_sizes + [output_sizes[-1]] * (num_layers - len(output_sizes))
    else:
        output_sizes = output_sizes[:num_layers]

    keys = iter(jax.random.split(key, 1024))

    def nrm(shape, scale=0.1):
        return (scale * jax.random.normal(next(keys), shape)).astype(jnp.float32)

    params = {}
    if input_size != output_sizes[0]:
        params["in_proj_w"] = nrm((input_size, output_sizes[0]))
        params["in_proj_b"] = jnp.zeros((1, output_sizes[0]), jnp.float32)

    d_state = mamba_config["d_state"]
    d_conv = mamba_config["d_conv"]
    expand = mamba_config["expand"]

    layers = []
    for i in range(num_layers):
        D = output_sizes[i]
        di = expand * D
        dt_rank = -(-D // 16)  # ceil(D / 16)

        # underlying (unfused) Mamba parameters
        W_in = nrm((D, 2 * di))
        b_in = jnp.zeros((1, 2 * di), jnp.float32)
        # TODO(synk): reference Mamba x_proj typically has no bias; b_x kept (zeros).
        W_x = nrm((di, dt_rank + 2 * d_state))
        b_x = jnp.zeros((1, dt_rank + 2 * d_state), jnp.float32)
        W_dt = nrm((dt_rank, di))
        b_dt = nrm((1, di), 0.01)
        A_log = jnp.log(jnp.broadcast_to(
            jnp.arange(1, d_state + 1, dtype=jnp.float32), (di, d_state)))

        mamba = dict(
            # in_proj split host-side into x-branch / gate-branch halves
            W_in_x=W_in[:, :di], b_in_x=b_in[:, :di],
            W_in_z=W_in[:, di:], b_in_z=b_in[:, di:],
            conv_w=nrm((d_conv, di)), conv_b=jnp.zeros((1, di), jnp.float32),
            # dt_proj folded into x_proj:
            #   delta_raw = u @ (W_x[:, :r] @ W_dt) + (b_x[:, :r] @ W_dt + b_dt)
            W_delta=W_x[:, :dt_rank] @ W_dt,
            b_delta=b_x[:, :dt_rank] @ W_dt + b_dt,
            W_bc=W_x[:, dt_rank:], b_bc=b_x[:, dt_rank:],
            # A stored pre-negated/exponentiated and transposed: (N, di), di on lanes
            A_t=(-jnp.exp(A_log)).T,
            D=jnp.ones((1, di), jnp.float32),
            W_out=nrm((di, D)), b_out=jnp.zeros((1, D), jnp.float32),
        )
        layers.append(dict(
            mamba=mamba,
            ln1_g=jnp.ones((1, D), jnp.float32), ln1_b=jnp.zeros((1, D), jnp.float32),
            ln2_g=jnp.ones((1, D), jnp.float32), ln2_b=jnp.zeros((1, D), jnp.float32),
            W1=nrm((D, d_ffn)), b1=jnp.zeros((1, d_ffn), jnp.float32),
            W2=nrm((d_ffn, D)), b2=jnp.zeros((1, D), jnp.float32),
        ))
    params["layers"] = layers
    return params


# ---------------------------------- main ------------------------------------ #

if __name__ == "__main__":
    key = jax.random.PRNGKey(0)

    B, L = 2, 8
    input_size = 16
    num_layers = 2
    output_sizes = [32, 32]
    d_ffn = 64
    mamba_config = dict(d_state=8, d_conv=4, expand=2, bidirectional=False)

    params = init_params(key, input_size, num_layers, output_sizes, d_ffn, mamba_config)
    x = jax.random.normal(jax.random.fold_in(key, 123), (B, L, input_size), jnp.float32)

    out = jax.jit(encoder_ssm)(x, params)
    out = jax.block_until_ready(out)

    assert out.shape == (B, L, output_sizes[-1]), out.shape
    assert bool(jnp.all(jnp.isfinite(out)))
    print("KERNEL_OK")
</pallas_src>

<mosaic_0001>
module attributes {stable_mosaic.version = 11 : i64} {
  func.func @conv_xproj_kernel(%arg0: i32, %arg1: memref<1x8x64xf32, #tpu.memory_space<vmem>>, %arg2: memref<4x64xf32, #tpu.memory_space<vmem>>, %arg3: memref<1x64xf32, #tpu.memory_space<vmem>>, %arg4: memref<64x64xf32, #tpu.memory_space<vmem>>, %arg5: memref<1x64xf32, #tpu.memory_space<vmem>>, %arg6: memref<64x16xf32, #tpu.memory_space<vmem>>, %arg7: memref<1x16xf32, #tpu.memory_space<vmem>>, %arg8: memref<1x8x64xf32, #tpu.memory_space<vmem>>, %arg9: memref<1x8x64xf32, #tpu.memory_space<vmem>>, %arg10: memref<1x8x16xf32, #tpu.memory_space<vmem>>) attributes {dimension_semantics = [#tpu.dimension_semantics<parallel>], iteration_bounds = array<i64: 2>, scalar_prefetch = 0 : i64, scratch_operands = 0 : i64, tpu.core_type = #tpu.core_type<tc>, window_params = [{transform_indices = @transform_0, window_bounds = array<i64: 1, 8, 64>}, {pipeline_mode = #tpu.pipeline_mode<synchronous>, transform_indices = @transform_1, window_bounds = array<i64: 4, 64>}, {pipeline_mode = #tpu.pipeline_mode<synchronous>, transform_indices = @transform_2, window_bounds = array<i64: 1, 64>}, {pipeline_mode = #tpu.pipeline_mode<synchronous>, transform_indices = @transform_3, window_bounds = array<i64: 64, 64>}, {pipeline_mode = #tpu.pipeline_mode<synchronous>, transform_indices = @transform_4, window_bounds = array<i64: 1, 64>}, {pipeline_mode = #tpu.pipeline_mode<synchronous>, transform_indices = @transform_5, window_bounds = array<i64: 64, 16>}, {pipeline_mode = #tpu.pipeline_mode<synchronous>, transform_indices = @transform_6, window_bounds = array<i64: 1, 16>}, {transform_indices = @transform_7, window_bounds = array<i64: 1, 8, 64>}, {transform_indices = @transform_8, window_bounds = array<i64: 1, 8, 64>}, {transform_indices = @transform_9, window_bounds = array<i64: 1, 8, 16>}]} {
    %c0 = arith.constant 0 : index
    %c0_0 = arith.constant 0 : index
    %c0_1 = arith.constant 0 : index
    %0 = vector.load %arg1[%c0, %c0_0, %c0_1] : memref<1x8x64xf32, #tpu.memory_space<vmem>>, vector<1x8x64xf32>
    %1 = vector.shape_cast %0 : vector<1x8x64xf32> to vector<8x64xf32>
    %c0_2 = arith.constant 0 : index
    %c0_3 = arith.constant 0 : index
    %2 = vector.load %arg2[%c0_2, %c0_3] : memref<4x64xf32, #tpu.memory_space<vmem>>, vector<4x64xf32>
    %cst = arith.constant 0.000000e+00 : f32
    %3 = vector.broadcast %cst : f32 to vector<3x64xf32>
    %4 = tpu.concatenate %3, %1 in 0 : vector<3x64xf32>, vector<8x64xf32> -> vector<11x64xf32>
    %5 = vector.extract_strided_slice %4 {offsets = [0, 0], sizes = [8, 64], strides = [1, 1]} : vector<11x64xf32> to vector<8x64xf32>
    %6 = vector.extract_strided_slice %2 {offsets = [0, 0], sizes = [1, 64], strides = [1, 1]} : vector<4x64xf32> to vector<1x64xf32>
    %7 = vector.shape_cast %6 : vector<1x64xf32> to vector<64xf32>
    %8 = vector.shape_cast %7 : vector<64xf32> to vector<1x64xf32>
    %9 = vector.broadcast %8 : vector<1x64xf32> to vector<8x64xf32>
    %10 = arith.mulf %5, %9 : vector<8x64xf32>
    %11 = vector.extract_strided_slice %4 {offsets = [1, 0], sizes = [8, 64], strides = [1, 1]} : vector<11x64xf32> to vector<8x64xf32>
    %12 = vector.extract_strided_slice %2 {offsets = [1, 0], sizes = [1, 64], strides = [1, 1]} : vector<4x64xf32> to vector<1x64xf32>
    %13 = vector.shape_cast %12 : vector<1x64xf32> to vector<64xf32>
    %14 = vector.shape_cast %13 : vector<64xf32> to vector<1x64xf32>
    %15 = vector.broadcast %14 : vector<1x64xf32> to vector<8x64xf32>
    %16 = arith.mulf %11, %15 : vector<8x64xf32>
    %17 = arith.addf %10, %16 : vector<8x64xf32>
    %18 = vector.extract_strided_slice %4 {offsets = [2, 0], sizes = [8, 64], strides = [1, 1]} : vector<11x64xf32> to vector<8x64xf32>
    %19 = vector.extract_strided_slice %2 {offsets = [2, 0], sizes = [1, 64], strides = [1, 1]} : vector<4x64xf32> to vector<1x64xf32>
    %20 = vector.shape_cast %19 : vector<1x64xf32> to vector<64xf32>
    %21 = vector.shape_cast %20 : vector<64xf32> to vector<1x64xf32>
    %22 = vector.broadcast %21 : vector<1x64xf32> to vector<8x64xf32>
    %23 = arith.mulf %18, %22 : vector<8x64xf32>
    %24 = arith.addf %17, %23 : vector<8x64xf32>
    %25 = vector.extract_strided_slice %4 {offsets = [3, 0], sizes = [8, 64], strides = [1, 1]} : vector<11x64xf32> to vector<8x64xf32>
    %26 = vector.extract_strided_slice %2 {offsets = [3, 0], sizes = [1, 64], strides = [1, 1]} : vector<4x64xf32> to vector<1x64xf32>
    %27 = vector.shape_cast %26 : vector<1x64xf32> to vector<64xf32>
    %28 = vector.shape_cast %27 : vector<64xf32> to vector<1x64xf32>
    %29 = vector.broadcast %28 : vector<1x64xf32> to vector<8x64xf32>
    %30 = arith.mulf %25, %29 : vector<8x64xf32>
    %31 = arith.addf %24, %30 : vector<8x64xf32>
    %c0_4 = arith.constant 0 : index
    %c0_5 = arith.constant 0 : index
    %32 = vector.load %arg3[%c0_4, %c0_5] : memref<1x64xf32, #tpu.memory_space<vmem>>, vector<1x64xf32>
    %33 = vector.broadcast %32 : vector<1x64xf32> to vector<8x64xf32>
    %34 = arith.addf %31, %33 : vector<8x64xf32>
    %35 = arith.negf %34 : vector<8x64xf32>
    %36 = math.exp %35 : vector<8x64xf32>
    %cst_6 = arith.constant 1.000000e+00 : f32
    %37 = vector.broadcast %cst_6 : f32 to vector<8x64xf32>
    %38 = arith.addf %37, %36 : vector<8x64xf32>
    %39 = arith.divf %37, %38 : vector<8x64xf32>
    %40 = arith.mulf %34, %39 : vector<8x64xf32>
    %c0_7 = arith.constant 0 : index
    %c0_8 = arith.constant 0 : index
    %c0_9 = arith.constant 0 : index
    %41 = vector.load %arg8[%c0_7, %c0_8, %c0_9] : memref<1x8x64xf32, #tpu.memory_space<vmem>>, vector<1x8x64xf32>
    %42 = vector.shape_cast %41 : vector<1x8x64xf32> to vector<8x64xf32>
    %43 = vector.shape_cast %40 : vector<8x64xf32> to vector<1x8x64xf32>
    tpu.vector_store %arg8[%c0_7, %c0_8, %c0_9], %43 {strides = array<i32>} : memref<1x8x64xf32, #tpu.memory_space<vmem>>, vector<1x8x64xf32>,
    %c0_10 = arith.constant 0 : index
    %c0_11 = arith.constant 0 : index
    %44 = vector.load %arg4[%c0_10, %c0_11] : memref<64x64xf32, #tpu.memory_space<vmem>>, vector<64x64xf32>
    %cst_12 = arith.constant dense<0.000000e+00> : vector<8x64xf32>
    %45 = tpu.matmul %40, %44, %cst_12 {dimension_numbers = #tpu.dot_dimension_numbers<[1], [0], [0], [1], [0, 0, 1, 1], [], []>} : vector<8x64xf32>, vector<64x64xf32>, vector<8x64xf32> -> vector<8x64xf32>
    %c0_13 = arith.constant 0 : index
    %c0_14 = arith.constant 0 : index
    %46 = vector.load %arg5[%c0_13, %c0_14] : memref<1x64xf32, #tpu.memory_space<vmem>>, vector<1x64xf32>
    %47 = vector.broadcast %46 : vector<1x64xf32> to vector<8x64xf32>
    %48 = arith.addf %45, %47 : vector<8x64xf32>
    %c0_15 = arith.constant 0 : index
    %c0_16 = arith.constant 0 : index
    %c0_17 = arith.constant 0 : index
    %49 = vector.load %arg9[%c0_15, %c0_16, %c0_17] : memref<1x8x64xf32, #tpu.memory_space<vmem>>, vector<1x8x64xf32>
    %50 = vector.shape_cast %49 : vector<1x8x64xf32> to vector<8x64xf32>
    %51 = vector.shape_cast %48 : vector<8x64xf32> to vector<1x8x64xf32>
    tpu.vector_store %arg9[%c0_15, %c0_16, %c0_17], %51 {strides = array<i32>} : memref<1x8x64xf32, #tpu.memory_space<vmem>>, vector<1x8x64xf32>,
    %c0_18 = arith.constant 0 : index
    %c0_19 = arith.constant 0 : index
    %52 = vector.load %arg6[%c0_18, %c0_19] : memref<64x16xf32, #tpu.memory_space<vmem>>, vector<64x16xf32>
    %cst_20 = arith.constant dense<0.000000e+00> : vector<8x16xf32>
    %53 = tpu.matmul %40, %52, %cst_20 {dimension_numbers = #tpu.dot_dimension_numbers<[1], [0], [0], [1], [0, 0, 1, 1], [], []>} : vector<8x64xf32>, vector<64x16xf32>, vector<8x16xf32> -> vector<8x16xf32>
    %c0_21 = arith.constant 0 : index
    %c0_22 = arith.constant 0 : index
    %54 = vector.load %arg7[%c0_21, %c0_22] : memref<1x16xf32, #tpu.memory_space<vmem>>, vector<1x16xf32>
    %55 = vector.broadcast %54 : vector<1x16xf32> to vector<8x16xf32>
    %56 = arith.addf %53, %55 : vector<8x16xf32>
    %c0_23 = arith.constant 0 : index
    %c0_24 = arith.constant 0 : index
    %c0_25 = arith.constant 0 : index
    %57 = vector.load %arg10[%c0_23, %c0_24, %c0_25] : memref<1x8x16xf32, #tpu.memory_space<vmem>>, vector<1x8x16xf32>
    %58 = vector.shape_cast %57 : vector<1x8x16xf32> to vector<8x16xf32>
    %59 = vector.shape_cast %56 : vector<8x16xf32> to vector<1x8x16xf32>
    tpu.vector_store %arg10[%c0_23, %c0_24, %c0_25], %59 {strides = array<i32>} : memref<1x8x16xf32, #tpu.memory_space<vmem>>, vector<1x8x16xf32>,
    return
  }
  func.func @transform_0(%arg0: i32) -> (i32, i32, i32) {
    %c0_i32 = arith.constant 0 : i32
    %c0_i32_0 = arith.constant 0 : i32
    %c0_i32_1 = arith.constant 0 : i32
    return %arg0, %c0_i32, %c0_i32_0 : i32, i32, i32
  }
  func.func @transform_1(%arg0: i32) -> (i32, i32) {
    %c0_i32 = arith.constant 0 : i32
    %c0_i32_0 = arith.constant 0 : i32
    %c0_i32_1 = arith.constant 0 : i32
    return %c0_i32, %c0_i32_0 : i32, i32
  }
  func.func @transform_2(%arg0: i32) -> (i32, i32) {
    %c0_i32 = arith.constant 0 : i32
    %c0_i32_0 = arith.constant 0 : i32
    %c0_i32_1 = arith.constant 0 : i32
    return %c0_i32, %c0_i32_0 : i32, i32
  }
  func.func @transform_3(%arg0: i32) -> (i32, i32) {
    %c0_i32 = arith.constant 0 : i32
    %c0_i32_0 = arith.constant 0 : i32
    %c0_i32_1 = arith.constant 0 : i32
    return %c0_i32, %c0_i32_0 : i32, i32
  }
  func.func @transform_4(%arg0: i32) -> (i32, i32) {
    %c0_i32 = arith.constant 0 : i32
    %c0_i32_0 = arith.constant 0 : i32
    %c0_i32_1 = arith.constant 0 : i32
    return %c0_i32, %c0_i32_0 : i32, i32
  }
  func.func @transform_5(%arg0: i32) -> (i32, i32) {
    %c0_i32 = arith.constant 0 : i32
    %c0_i32_0 = arith.constant 0 : i32
    %c0_i32_1 = arith.constant 0 : i32
    return %c0_i32, %c0_i32_0 : i32, i32
  }
  func.func @transform_6(%arg0: i32) -> (i32, i32) {
    %c0_i32 = arith.constant 0 : i32
    %c0_i32_0 = arith.constant 0 : i32
    %c0_i32_1 = arith.constant 0 : i32
    return %c0_i32, %c0_i32_0 : i32, i32
  }
  func.func @transform_7(%arg0: i32) -> (i32, i32, i32) {
    %c0_i32 = arith.constant 0 : i32
    %c0_i32_0 = arith.constant 0 : i32
    %c0_i32_1 = arith.constant 0 : i32
    return %arg0, %c0_i32, %c0_i32_0 : i32, i32, i32
  }
  func.func @transform_8(%arg0: i32) -> (i32, i32, i32) {
    %c0_i32 = arith.constant 0 : i32
    %c0_i32_0 = arith.constant 0 : i32
    %c0_i32_1 = arith.constant 0 : i32
    return %arg0, %c0_i32, %c0_i32_0 : i32, i32, i32
  }
  func.func @transform_9(%arg0: i32) -> (i32, i32, i32) {
    %c0_i32 = arith.constant 0 : i32
    %c0_i32_0 = arith.constant 0 : i32
    %c0_i32_1 = arith.constant 0 : i32
    return %arg0, %c0_i32, %c0_i32_0 : i32, i32, i32
  }
}

module attributes {stable_mosaic.version = 11 : i64} {
  func.func @ln_in_proj_kernel(%arg0: i32, %arg1: memref<16x32xf32, #tpu.memory_space<vmem>>, %arg2: memref<1x32xf32, #tpu.memory_space<vmem>>, %arg3: memref<1x32xf32, #tpu.memory_space<vmem>>, %arg4: memref<32x64xf32, #tpu.memory_space<vmem>>, %arg5: memref<1x64xf32, #tpu.memory_space<vmem>>, %arg6: memref<32x64xf32, #tpu.memory_space<vmem>>, %arg7: memref<1x64xf32, #tpu.memory_space<vmem>>, %arg8: memref<16x64xf32, #tpu.memory_space<vmem>>, %arg9: memref<16x64xf32, #tpu.memory_space<vmem>>) attributes {dimension_semantics = [#tpu.dimension_semantics<parallel>], iteration_bounds = array<i64: 1>, scalar_prefetch = 0 : i64, scratch_operands = 0 : i64, tpu.core_type = #tpu.core_type<tc>, window_params = [{transform_indices = @transform_0, window_bounds = array<i64: 16, 32>}, {pipeline_mode = #tpu.pipeline_mode<synchronous>, transform_indices = @transform_1, window_bounds = array<i64: 1, 32>}, {pipeline_mode = #tpu.pipeline_mode<synchronous>, transform_indices = @transform_2, window_bounds = array<i64: 1, 32>}, {pipeline_mode = #tpu.pipeline_mode<synchronous>, transform_indices = @transform_3, window_bounds = array<i64: 32, 64>}, {pipeline_mode = #tpu.pipeline_mode<synchronous>, transform_indices = @transform_4, window_bounds = array<i64: 1, 64>}, {pipeline_mode = #tpu.pipeline_mode<synchronous>, transform_indices = @transform_5, window_bounds = array<i64: 32, 64>}, {pipeline_mode = #tpu.pipeline_mode<synchronous>, transform_indices = @transform_6, window_bounds = array<i64: 1, 64>}, {transform_indices = @transform_7, window_bounds = array<i64: 16, 64>}, {transform_indices = @transform_8, window_bounds = array<i64: 16, 64>}]} {
    %c0 = arith.constant 0 : index
    %c0_0 = arith.constant 0 : index
    %0 = vector.load %arg1[%c0, %c0_0] : memref<16x32xf32, #tpu.memory_space<vmem>>, vector<16x32xf32>
    %c0_1 = arith.constant 0 : index
    %c0_2 = arith.constant 0 : index
    %1 = vector.load %arg2[%c0_1, %c0_2] : memref<1x32xf32, #tpu.memory_space<vmem>>, vector<1x32xf32>
    %c0_3 = arith.constant 0 : index
    %c0_4 = arith.constant 0 : index
    %2 = vector.load %arg3[%c0_3, %c0_4] : memref<1x32xf32, #tpu.memory_space<vmem>>, vector<1x32xf32>
    %cst = arith.constant dense<0.000000e+00> : vector<16xf32>
    %3 = vector.multi_reduction <add>, %0, %cst [1] : vector<16x32xf32> to vector<16xf32>
    %4 = vector.shape_cast %3 : vector<16xf32> to vector<16x1xf32>
    %cst_5 = arith.constant 3.200000e+01 : f32
    %5 = vector.broadcast %cst_5 : f32 to vector<16x1xf32>
    %6 = arith.divf %4, %5 : vector<16x1xf32>
    %7 = vector.broadcast %6 : vector<16x1xf32> to vector<16x32xf32>
    %8 = arith.subf %0, %7 : vector<16x32xf32>
    %9 = arith.mulf %8, %8 : vector<16x32xf32>
    %cst_6 = arith.constant dense<0.000000e+00> : vector<16xf32>
    %10 = vector.multi_reduction <add>, %9, %cst_6 [1] : vector<16x32xf32> to vector<16xf32>
    %11 = vector.shape_cast %10 : vector<16xf32> to vector<16x1xf32>
    %cst_7 = arith.constant 3.200000e+01 : f32
    %12 = vector.broadcast %cst_7 : f32 to vector<16x1xf32>
    %13 = arith.divf %11, %12 : vector<16x1xf32>
    %14 = vector.broadcast %6 : vector<16x1xf32> to vector<16x32xf32>
    %15 = arith.subf %0, %14 : vector<16x32xf32>
    %cst_8 = arith.constant 9.99999974E-6 : f32
    %16 = vector.broadcast %cst_8 : f32 to vector<16x1xf32>
    %17 = arith.addf %13, %16 : vector<16x1xf32>
    %18 = math.rsqrt %17 : vector<16x1xf32>
    %19 = vector.broadcast %18 : vector<16x1xf32> to vector<16x32xf32>
    %20 = arith.mulf %15, %19 : vector<16x32xf32>
    %21 = vector.broadcast %1 : vector<1x32xf32> to vector<16x32xf32>
    %22 = arith.mulf %20, %21 : vector<16x32xf32>
    %23 = vector.broadcast %2 : vector<1x32xf32> to vector<16x32xf32>
    %24 = arith.addf %22, %23 : vector<16x32xf32>
    %c0_9 = arith.constant 0 : index
    %c0_10 = arith.constant 0 : index
    %25 = vector.load %arg4[%c0_9, %c0_10] : memref<32x64xf32, #tpu.memory_space<vmem>>, vector<32x64xf32>
    %cst_11 = arith.constant dense<0.000000e+00> : vector<16x64xf32>
    %26 = tpu.matmul %24, %25, %cst_11 {dimension_numbers = #tpu.dot_dimension_numbers<[1], [0], [0], [1], [0, 0, 1, 1], [], []>} : vector<16x32xf32>, vector<32x64xf32>, vector<16x64xf32> -> vector<16x64xf32>
    %c0_12 = arith.constant 0 : index
    %c0_13 = arith.constant 0 : index
    %27 = vector.load %arg5[%c0_12, %c0_13] : memref<1x64xf32, #tpu.memory_space<vmem>>, vector<1x64xf32>
    %28 = vector.broadcast %27 : vector<1x64xf32> to vector<16x64xf32>
    %29 = arith.addf %26, %28 : vector<16x64xf32>
    %c0_14 = arith.constant 0 : index
    %c0_15 = arith.constant 0 : index
    %30 = vector.load %arg8[%c0_14, %c0_15] : memref<16x64xf32, #tpu.memory_space<vmem>>, vector<16x64xf32>
    tpu.vector_store %arg8[%c0_14, %c0_15], %29 {strides = array<i32>} : memref<16x64xf32, #tpu.memory_space<vmem>>, vector<16x64xf32>,
    %c0_16 = arith.constant 0 : index
    %c0_17 = arith.constant 0 : index
    %31 = vector.load %arg6[%c0_16, %c0_17] : memref<32x64xf32, #tpu.memory_space<vmem>>, vector<32x64xf32>
    %cst_18 = arith.constant dense<0.000000e+00> : vector<16x64xf32>
    %32 = tpu.matmul %24, %31, %cst_18 {dimension_numbers = #tpu.dot_dimension_numbers<[1], [0], [0], [1], [0, 0, 1, 1], [], []>} : vector<16x32xf32>, vector<32x64xf32>, vector<16x64xf32> -> vector<16x64xf32>
    %c0_19 = arith.constant 0 : index
    %c0_20 = arith.constant 0 : index
    %33 = vector.load %arg7[%c0_19, %c0_20] : memref<1x64xf32, #tpu.memory_space<vmem>>, vector<1x64xf32>
    %34 = vector.broadcast %33 : vector<1x64xf32> to vector<16x64xf32>
    %35 = arith.addf %32, %34 : vector<16x64xf32>
    %c0_21 = arith.constant 0 : index
    %c0_22 = arith.constant 0 : index
    %36 = vector.load %arg9[%c0_21, %c0_22] : memref<16x64xf32, #tpu.memory_space<vmem>>, vector<16x64xf32>
    tpu.vector_store %arg9[%c0_21, %c0_22], %35 {strides = array<i32>} : memref<16x64xf32, #tpu.memory_space<vmem>>, vector<16x64xf32>,
    return
  }
  func.func @transform_0(%arg0: i32) -> (i32, i32) {
    %c0_i32 = arith.constant 0 : i32
    %c0_i32_0 = arith.constant 0 : i32
    return %arg0, %c0_i32 : i32, i32
  }
  func.func @transform_1(%arg0: i32) -> (i32, i32) {
    %c0_i32 = arith.constant 0 : i32
    %c0_i32_0 = arith.constant 0 : i32
    %c0_i32_1 = arith.constant 0 : i32
    return %c0_i32, %c0_i32_0 : i32, i32
  }
  func.func @transform_2(%arg0: i32) -> (i32, i32) {
    %c0_i32 = arith.constant 0 : i32
    %c0_i32_0 = arith.constant 0 : i32
    %c0_i32_1 = arith.constant 0 : i32
    return %c0_i32, %c0_i32_0 : i32, i32
  }
  func.func @transform_3(%arg0: i32) -> (i32, i32) {
    %c0_i32 = arith.constant 0 : i32
    %c0_i32_0 = arith.constant 0 : i32
    %c0_i32_1 = arith.constant 0 : i32
    return %c0_i32, %c0_i32_0 : i32, i32
  }
  func.func @transform_4(%arg0: i32) -> (i32, i32) {
    %c0_i32 = arith.constant 0 : i32
    %c0_i32_0 = arith.constant 0 : i32
    %c0_i32_1 = arith.constant 0 : i32
    return %c0_i32, %c0_i32_0 : i32, i32
  }
  func.func @transform_5(%arg0: i32) -> (i32, i32) {
    %c0_i32 = arith.constant 0 : i32
    %c0_i32_0 = arith.constant 0 : i32
    %c0_i32_1 = arith.constant 0 : i32
    return %c0_i32, %c0_i32_0 : i32, i32
  }
  func.func @transform_6(%arg0: i32) -> (i32, i32) {
    %c0_i32 = arith.constant 0 : i32
    %c0_i32_0 = arith.constant 0 : i32
    %c0_i32_1 = arith.constant 0 : i32
    return %c0_i32, %c0_i32_0 : i32, i32
  }
  func.func @transform_7(%arg0: i32) -> (i32, i32) {
    %c0_i32 = arith.constant 0 : i32
    %c0_i32_0 = arith.constant 0 : i32
    return %arg0, %c0_i32 : i32, i32
  }
  func.func @transform_8(%arg0: i32) -> (i32, i32) {
    %c0_i32 = arith.constant 0 : i32
    %c0_i32_0 = arith.constant 0 : i32
    return %arg0, %c0_i32 : i32, i32
  }
}

module attributes {stable_mosaic.version = 11 : i64} {
  func.func @linear_kernel(%arg0: i32, %arg1: memref<16x16xf32, #tpu.memory_space<vmem>>, %arg2: memref<16x32xf32, #tpu.memory_space<vmem>>, %arg3: memref<1x32xf32, #tpu.memory_space<vmem>>, %arg4: memref<16x32xf32, #tpu.memory_space<vmem>>) attributes {dimension_semantics = [#tpu.dimension_semantics<parallel>], iteration_bounds = array<i64: 1>, scalar_prefetch = 0 : i64, scratch_operands = 0 : i64, tpu.core_type = #tpu.core_type<tc>, window_params = [{transform_indices = @transform_0, window_bounds = array<i64: 16, 16>}, {pipeline_mode = #tpu.pipeline_mode<synchronous>, transform_indices = @transform_1, window_bounds = array<i64: 16, 32>}, {pipeline_mode = #tpu.pipeline_mode<synchronous>, transform_indices = @transform_2, window_bounds = array<i64: 1, 32>}, {transform_indices = @transform_3, window_bounds = array<i64: 16, 32>}]} {
    %c0 = arith.constant 0 : index
    %c0_0 = arith.constant 0 : index
    %0 = vector.load %arg1[%c0, %c0_0] : memref<16x16xf32, #tpu.memory_space<vmem>>, vector<16x16xf32>
    %c0_1 = arith.constant 0 : index
    %c0_2 = arith.constant 0 : index
    %1 = vector.load %arg2[%c0_1, %c0_2] : memref<16x32xf32, #tpu.memory_space<vmem>>, vector<16x32xf32>
    %cst = arith.constant dense<0.000000e+00> : vector<16x32xf32>
    %2 = tpu.matmul %0, %1, %cst {dimension_numbers = #tpu.dot_dimension_numbers<[1], [0], [0], [1], [0, 0, 1, 1], [], []>} : vector<16x16xf32>, vector<16x32xf32>, vector<16x32xf32> -> vector<16x32xf32>
    %c0_3 = arith.constant 0 : index
    %c0_4 = arith.constant 0 : index
    %3 = vector.load %arg3[%c0_3, %c0_4] : memref<1x32xf32, #tpu.memory_space<vmem>>, vector<1x32xf32>
    %4 = vector.broadcast %3 : vector<1x32xf32> to vector<16x32xf32>
    %5 = arith.addf %2, %4 : vector<16x32xf32>
    %c0_5 = arith.constant 0 : index
    %c0_6 = arith.constant 0 : index
    %6 = vector.load %arg4[%c0_5, %c0_6] : memref<16x32xf32, #tpu.memory_space<vmem>>, vector<16x32xf32>
    tpu.vector_store %arg4[%c0_5, %c0_6], %5 {strides = array<i32>} : memref<16x32xf32, #tpu.memory_space<vmem>>, vector<16x32xf32>,
    return
  }
  func.func @transform_0(%arg0: i32) -> (i32, i32) {
    %c0_i32 = arith.constant 0 : i32
    %c0_i32_0 = arith.constant 0 : i32
    return %arg0, %c0_i32 : i32, i32
  }
  func.func @transform_1(%arg0: i32) -> (i32, i32) {
    %c0_i32 = arith.constant 0 : i32
    %c0_i32_0 = arith.constant 0 : i32
    %c0_i32_1 = arith.constant 0 : i32
    return %c0_i32, %c0_i32_0 : i32, i32
  }
  func.func @transform_2(%arg0: i32) -> (i32, i32) {
    %c0_i32 = arith.constant 0 : i32
    %c0_i32_0 = arith.constant 0 : i32
    %c0_i32_1 = arith.constant 0 : i32
    return %c0_i32, %c0_i32_0 : i32, i32
  }
  func.func @transform_3(%arg0: i32) -> (i32, i32) {
    %c0_i32 = arith.constant 0 : i32
    %c0_i32_0 = arith.constant 0 : i32
    return %arg0, %c0_i32 : i32, i32
  }
}

module attributes {stable_mosaic.version = 11 : i64} {
  func.func @ssm_scan_kernel(%arg0: i32, %arg1: i32, %arg2: memref<1x8x64xf32, #tpu.memory_space<vmem>>, %arg3: memref<1x8x64xf32, #tpu.memory_space<vmem>>, %arg4: memref<1x8x64xf32, #tpu.memory_space<vmem>>, %arg5: memref<1x16x8xf32, #tpu.memory_space<vmem>>, %arg6: memref<8x64xf32, #tpu.memory_space<vmem>>, %arg7: memref<1x64xf32, #tpu.memory_space<vmem>>, %arg8: memref<1x8x64xf32, #tpu.memory_space<vmem>>) attributes {dimension_semantics = [#tpu.dimension_semantics<parallel>, #tpu.dimension_semantics<parallel>], iteration_bounds = array<i64: 2, 1>, scalar_prefetch = 0 : i64, scratch_operands = 0 : i64, tpu.core_type = #tpu.core_type<tc>, window_params = [{transform_indices = @transform_0, window_bounds = array<i64: 1, 8, 64>}, {transform_indices = @transform_1, window_bounds = array<i64: 1, 8, 64>}, {transform_indices = @transform_2, window_bounds = array<i64: 1, 8, 64>}, {transform_indices = @transform_3, window_bounds = array<i64: 1, 16, 8>}, {transform_indices = @transform_4, window_bounds = array<i64: 8, 64>}, {transform_indices = @transform_5, window_bounds = array<i64: 1, 64>}, {transform_indices = @transform_6, window_bounds = array<i64: 1, 8, 64>}]} {
    %c0 = arith.constant 0 : index
    %c0_0 = arith.constant 0 : index
    %0 = vector.load %arg6[%c0, %c0_0] : memref<8x64xf32, #tpu.memory_space<vmem>>, vector<8x64xf32>
    %c0_1 = arith.constant 0 : index
    %c0_2 = arith.constant 0 : index
    %1 = vector.load %arg7[%c0_1, %c0_2] : memref<1x64xf32, #tpu.memory_space<vmem>>, vector<1x64xf32>
    %c0_3 = arith.constant 0 : index
    %c0_4 = arith.constant 0 : index
    %c0_5 = arith.constant 0 : index
    %2 = vector.load %arg5[%c0_3, %c0_4, %c0_5] : memref<1x16x8xf32, #tpu.memory_space<vmem>>, vector<1x16x8xf32>
    %3 = vector.shape_cast %2 : vector<1x16x8xf32> to vector<16x8xf32>
    %4 = tpu.iota {dimensions = array<i32: 1>} : vector<1x8xi32>
    %cst = arith.constant 0.000000e+00 : f32
    %5 = vector.broadcast %cst : f32 to vector<8x64xf32>
    %c0_i32 = arith.constant 0 : i32
    %c8_i32 = arith.constant 8 : i32
    %6 = arith.addi %c0_i32, %c8_i32 : i32
    %c1_i32 = arith.constant 1 : i32
    %7 = scf.for %arg9 = %c0_i32 to %6 step %c1_i32 iter_args(%arg10 = %5) -> (vector<8x64xf32>)  : i32 {
      %c0_7 = arith.constant 0 : index
      %8 = arith.index_cast %arg9 : i32 to index
      %c0_8 = arith.constant 0 : index
      %9 = vector.load %arg2[%c0_7, %8, %c0_8] : memref<1x8x64xf32, #tpu.memory_space<vmem>>, vector<1x1x64xf32>
      %10 = vector.shape_cast %9 : vector<1x1x64xf32> to vector<1x64xf32>
      %c0_9 = arith.constant 0 : index
      %11 = arith.index_cast %arg9 : i32 to index
      %c0_10 = arith.constant 0 : index
      %12 = vector.load %arg3[%c0_9, %11, %c0_10] : memref<1x8x64xf32, #tpu.memory_space<vmem>>, vector<1x1x64xf32>
      %13 = vector.shape_cast %12 : vector<1x1x64xf32> to vector<1x64xf32>
      %cst_11 = arith.constant 2.000000e+01 : f32
      %14 = vector.broadcast %cst_11 : f32 to vector<1x64xf32>
      %15 = arith.cmpf ogt, %13, %14 : vector<1x64xf32>
      %cst_12 = arith.constant 2.000000e+01 : f32
      %16 = vector.broadcast %cst_12 : f32 to vector<1x64xf32>
      %17 = arith.minimumf %13, %16 : vector<1x64xf32>
      %18 = math.exp %17 : vector<1x64xf32>
      %cst_13 = arith.constant 1.000000e+00 : f32
      %19 = vector.broadcast %cst_13 : f32 to vector<1x64xf32>
      %20 = arith.addf %19, %18 : vector<1x64xf32>
      %21 = math.log %20 : vector<1x64xf32>
      %22 = arith.select %15, %13, %21 : vector<1x64xi1>, vector<1x64xf32>
      %23 = vector.broadcast %arg9 : i32 to vector<1x8xi32>
      %24 = arith.cmpi eq, %4, %23 : vector<1x8xi32>
      %25 = arith.extui %24 : vector<1x8xi1> to vector<1x8xi32>
      %26 = arith.sitofp %25 : vector<1x8xi32> to vector<1x8xf32>
      %27 = vector.broadcast %26 : vector<1x8xf32> to vector<16x8xf32>
      %28 = arith.mulf %3, %27 : vector<16x8xf32>
      %cst_14 = arith.constant dense<0.000000e+00> : vector<16xf32>
      %29 = vector.multi_reduction <add>, %28, %cst_14 [1] : vector<16x8xf32> to vector<16xf32>
      %30 = vector.shape_cast %29 : vector<16xf32> to vector<16x1xf32>
      %31 = vector.extract_strided_slice %30 {offsets = [0, 0], sizes = [8, 1], strides = [1, 1]} : vector<16x1xf32> to vector<8x1xf32>
      %32 = vector.extract_strided_slice %30 {offsets = [8, 0], sizes = [8, 1], strides = [1, 1]} : vector<16x1xf32> to vector<8x1xf32>
      %33 = vector.broadcast %22 : vector<1x64xf32> to vector<8x64xf32>
      %34 = arith.mulf %33, %0 : vector<8x64xf32>
      %35 = math.exp %34 : vector<8x64xf32>
      %36 = arith.mulf %35, %arg10 : vector<8x64xf32>
      %37 = arith.mulf %22, %10 : vector<1x64xf32>
      %38 = vector.broadcast %31 : vector<8x1xf32> to vector<8x64xf32>
      %39 = vector.broadcast %37 : vector<1x64xf32> to vector<8x64xf32>
      %40 = arith.mulf %38, %39 : vector<8x64xf32>
      %41 = arith.addf %36, %40 : vector<8x64xf32>
      %42 = vector.broadcast %32 : vector<8x1xf32> to vector<8x64xf32>
      %43 = arith.mulf %41, %42 : vector<8x64xf32>
      %cst_15 = arith.constant dense<0.000000e+00> : vector<64xf32>
      %44 = vector.multi_reduction <add>, %43, %cst_15 [0] : vector<8x64xf32> to vector<64xf32>
      %45 = vector.shape_cast %44 : vector<64xf32> to vector<1x64xf32>
      %46 = arith.mulf %1, %10 : vector<1x64xf32>
      %47 = arith.addf %45, %46 : vector<1x64xf32>
      %c0_16 = arith.constant 0 : index
      %48 = arith.index_cast %arg9 : i32 to index
      %c0_17 = arith.constant 0 : index
      %49 = vector.load %arg4[%c0_16, %48, %c0_17] : memref<1x8x64xf32, #tpu.memory_space<vmem>>, vector<1x1x64xf32>
      %50 = vector.shape_cast %49 : vector<1x1x64xf32> to vector<1x64xf32>
      %51 = arith.negf %50 : vector<1x64xf32>
      %52 = math.exp %51 : vector<1x64xf32>
      %cst_18 = arith.constant 1.000000e+00 : f32
      %53 = vector.broadcast %cst_18 : f32 to vector<1x64xf32>
      %54 = arith.addf %53, %52 : vector<1x64xf32>
      %55 = arith.divf %53, %54 : vector<1x64xf32>
      %56 = arith.mulf %50, %55 : vector<1x64xf32>
      %57 = arith.mulf %47, %56 : vector<1x64xf32>
      %c0_19 = arith.constant 0 : index
      %58 = arith.index_cast %arg9 : i32 to index
      %c0_20 = arith.constant 0 : index
      %59 = vector.load %arg8[%c0_19, %58, %c0_20] : memref<1x8x64xf32, #tpu.memory_space<vmem>>, vector<1x1x64xf32>
      %60 = vector.shape_cast %59 : vector<1x1x64xf32> to vector<1x64xf32>
      %61 = vector.shape_cast %57 : vector<1x64xf32> to vector<1x1x64xf32>
      tpu.vector_store %arg8[%c0_19, %58, %c0_20], %61 {strides = array<i32>} : memref<1x8x64xf32, #tpu.memory_space<vmem>>, vector<1x1x64xf32>,
      scf.yield %41 : vector<8x64xf32>
    }
    %c8_i32_6 = arith.constant 8 : i32
    return
  }
  func.func @transform_0(%arg0: i32, %arg1: i32) -> (i32, i32, i32) {
    %c0_i32 = arith.constant 0 : i32
    %c0_i32_0 = arith.constant 0 : i32
    return %arg0, %c0_i32, %arg1 : i32, i32, i32
  }
  func.func @transform_1(%arg0: i32, %arg1: i32) -> (i32, i32, i32) {
    %c0_i32 = arith.constant 0 : i32
    %c0_i32_0 = arith.constant 0 : i32
    return %arg0, %c0_i32, %arg1 : i32, i32, i32
  }
  func.func @transform_2(%arg0: i32, %arg1: i32) -> (i32, i32, i32) {
    %c0_i32 = arith.constant 0 : i32
    %c0_i32_0 = arith.constant 0 : i32
    return %arg0, %c0_i32, %arg1 : i32, i32, i32
  }
  func.func @transform_3(%arg0: i32, %arg1: i32) -> (i32, i32, i32) {
    %c0_i32 = arith.constant 0 : i32
    %c0_i32_0 = arith.constant 0 : i32
    %c0_i32_1 = arith.constant 0 : i32
    return %arg0, %c0_i32, %c0_i32_0 : i32, i32, i32
  }
  func.func @transform_4(%arg0: i32, %arg1: i32) -> (i32, i32) {
    %c0_i32 = arith.constant 0 : i32
    %c0_i32_0 = arith.constant 0 : i32
    return %c0_i32, %arg1 : i32, i32
  }
  func.func @transform_5(%arg0: i32, %arg1: i32) -> (i32, i32) {
    %c0_i32 = arith.constant 0 : i32
    %c0_i32_0 = arith.constant 0 : i32
    return %c0_i32, %arg1 : i32, i32
  }
  func.func @transform_6(%arg0: i32, %arg1: i32) -> (i32, i32, i32) {
    %c0_i32 = arith.constant 0 : i32
    %c0_i32_0 = arith.constant 0 : i32
    return %arg0, %c0_i32, %arg1 : i32, i32, i32
  }
}

module attributes {stable_mosaic.version = 11 : i64} {
  func.func @out_proj_residual_kernel(%arg0: i32, %arg1: memref<16x64xf32, #tpu.memory_space<vmem>>, %arg2: memref<16x32xf32, #tpu.memory_space<vmem>>, %arg3: memref<64x32xf32, #tpu.memory_space<vmem>>, %arg4: memref<1x32xf32, #tpu.memory_space<vmem>>, %arg5: memref<16x32xf32, #tpu.memory_space<vmem>>) attributes {dimension_semantics = [#tpu.dimension_semantics<parallel>], iteration_bounds = array<i64: 1>, scalar_prefetch = 0 : i64, scratch_operands = 0 : i64, tpu.core_type = #tpu.core_type<tc>, window_params = [{transform_indices = @transform_0, window_bounds = array<i64: 16, 64>}, {transform_indices = @transform_1, window_bounds = array<i64: 16, 32>}, {pipeline_mode = #tpu.pipeline_mode<synchronous>, transform_indices = @transform_2, window_bounds = array<i64: 64, 32>}, {pipeline_mode = #tpu.pipeline_mode<synchronous>, transform_indices = @transform_3, window_bounds = array<i64: 1, 32>}, {transform_indices = @transform_4, window_bounds = array<i64: 16, 32>}]} {
    %c0 = arith.constant 0 : index
    %c0_0 = arith.constant 0 : index
    %0 = vector.load %arg2[%c0, %c0_0] : memref<16x32xf32, #tpu.memory_space<vmem>>, vector<16x32xf32>
    %c0_1 = arith.constant 0 : index
    %c0_2 = arith.constant 0 : index
    %1 = vector.load %arg1[%c0_1, %c0_2] : memref<16x64xf32, #tpu.memory_space<vmem>>, vector<16x64xf32>
    %c0_3 = arith.constant 0 : index
    %c0_4 = arith.constant 0 : index
    %2 = vector.load %arg3[%c0_3, %c0_4] : memref<64x32xf32, #tpu.memory_space<vmem>>, vector<64x32xf32>
    %cst = arith.constant dense<0.000000e+00> : vector<16x32xf32>
    %3 = tpu.matmul %1, %2, %cst {dimension_numbers = #tpu.dot_dimension_numbers<[1], [0], [0], [1], [0, 0, 1, 1], [], []>} : vector<16x64xf32>, vector<64x32xf32>, vector<16x32xf32> -> vector<16x32xf32>
    %4 = arith.addf %0, %3 : vector<16x32xf32>
    %c0_5 = arith.constant 0 : index
    %c0_6 = arith.constant 0 : index
    %5 = vector.load %arg4[%c0_5, %c0_6] : memref<1x32xf32, #tpu.memory_space<vmem>>, vector<1x32xf32>
    %6 = vector.broadcast %5 : vector<1x32xf32> to vector<16x32xf32>
    %7 = arith.addf %4, %6 : vector<16x32xf32>
    %c0_7 = arith.constant 0 : index
    %c0_8 = arith.constant 0 : index
    %8 = vector.load %arg5[%c0_7, %c0_8] : memref<16x32xf32, #tpu.memory_space<vmem>>, vector<16x32xf32>
    tpu.vector_store %arg5[%c0_7, %c0_8], %7 {strides = array<i32>} : memref<16x32xf32, #tpu.memory_space<vmem>>, vector<16x32xf32>,
    return
  }
  func.func @transform_0(%arg0: i32) -> (i32, i32) {
    %c0_i32 = arith.constant 0 : i32
    %c0_i32_0 = arith.constant 0 : i32
    return %arg0, %c0_i32 : i32, i32
  }
  func.func @transform_1(%arg0: i32) -> (i32, i32) {
    %c0_i32 = arith.constant 0 : i32
    %c0_i32_0 = arith.constant 0 : i32
    return %arg0, %c0_i32 : i32, i32
  }
  func.func @transform_2(%arg0: i32) -> (i32, i32) {
    %c0_i32 = arith.constant 0 : i32
    %c0_i32_0 = arith.constant 0 : i32
    %c0_i32_1 = arith.constant 0 : i32
    return %c0_i32, %c0_i32_0 : i32, i32
  }
  func.func @transform_3(%arg0: i32) -> (i32, i32) {
    %c0_i32 = arith.constant 0 : i32
    %c0_i32_0 = arith.constant 0 : i32
    %c0_i32_1 = arith.constant 0 : i32
    return %c0_i32, %c0_i32_0 : i32, i32
  }
  func.func @transform_4(%arg0: i32) -> (i32, i32) {
    %c0_i32 = arith.constant 0 : i32
    %c0_i32_0 = arith.constant 0 : i32
    return %arg0, %c0_i32 : i32, i32
  }
}

module attributes {stable_mosaic.version = 11 : i64} {
  func.func @ln_ffn_residual_kernel(%arg0: i32, %arg1: memref<16x32xf32, #tpu.memory_space<vmem>>, %arg2: memref<1x32xf32, #tpu.memory_space<vmem>>, %arg3: memref<1x32xf32, #tpu.memory_space<vmem>>, %arg4: memref<32x64xf32, #tpu.memory_space<vmem>>, %arg5: memref<1x64xf32, #tpu.memory_space<vmem>>, %arg6: memref<64x32xf32, #tpu.memory_space<vmem>>, %arg7: memref<1x32xf32, #tpu.memory_space<vmem>>, %arg8: memref<16x32xf32, #tpu.memory_space<vmem>>) attributes {dimension_semantics = [#tpu.dimension_semantics<parallel>], iteration_bounds = array<i64: 1>, scalar_prefetch = 0 : i64, scratch_operands = 0 : i64, tpu.core_type = #tpu.core_type<tc>, window_params = [{transform_indices = @transform_0, window_bounds = array<i64: 16, 32>}, {pipeline_mode = #tpu.pipeline_mode<synchronous>, transform_indices = @transform_1, window_bounds = array<i64: 1, 32>}, {pipeline_mode = #tpu.pipeline_mode<synchronous>, transform_indices = @transform_2, window_bounds = array<i64: 1, 32>}, {pipeline_mode = #tpu.pipeline_mode<synchronous>, transform_indices = @transform_3, window_bounds = array<i64: 32, 64>}, {pipeline_mode = #tpu.pipeline_mode<synchronous>, transform_indices = @transform_4, window_bounds = array<i64: 1, 64>}, {pipeline_mode = #tpu.pipeline_mode<synchronous>, transform_indices = @transform_5, window_bounds = array<i64: 64, 32>}, {pipeline_mode = #tpu.pipeline_mode<synchronous>, transform_indices = @transform_6, window_bounds = array<i64: 1, 32>}, {transform_indices = @transform_7, window_bounds = array<i64: 16, 32>}]} {
    %c0 = arith.constant 0 : index
    %c0_0 = arith.constant 0 : index
    %0 = vector.load %arg1[%c0, %c0_0] : memref<16x32xf32, #tpu.memory_space<vmem>>, vector<16x32xf32>
    %c0_1 = arith.constant 0 : index
    %c0_2 = arith.constant 0 : index
    %1 = vector.load %arg2[%c0_1, %c0_2] : memref<1x32xf32, #tpu.memory_space<vmem>>, vector<1x32xf32>
    %c0_3 = arith.constant 0 : index
    %c0_4 = arith.constant 0 : index
    %2 = vector.load %arg3[%c0_3, %c0_4] : memref<1x32xf32, #tpu.memory_space<vmem>>, vector<1x32xf32>
    %cst = arith.constant dense<0.000000e+00> : vector<16xf32>
    %3 = vector.multi_reduction <add>, %0, %cst [1] : vector<16x32xf32> to vector<16xf32>
    %4 = vector.shape_cast %3 : vector<16xf32> to vector<16x1xf32>
    %cst_5 = arith.constant 3.200000e+01 : f32
    %5 = vector.broadcast %cst_5 : f32 to vector<16x1xf32>
    %6 = arith.divf %4, %5 : vector<16x1xf32>
    %7 = vector.broadcast %6 : vector<16x1xf32> to vector<16x32xf32>
    %8 = arith.subf %0, %7 : vector<16x32xf32>
    %9 = arith.mulf %8, %8 : vector<16x32xf32>
    %cst_6 = arith.constant dense<0.000000e+00> : vector<16xf32>
    %10 = vector.multi_reduction <add>, %9, %cst_6 [1] : vector<16x32xf32> to vector<16xf32>
    %11 = vector.shape_cast %10 : vector<16xf32> to vector<16x1xf32>
    %cst_7 = arith.constant 3.200000e+01 : f32
    %12 = vector.broadcast %cst_7 : f32 to vector<16x1xf32>
    %13 = arith.divf %11, %12 : vector<16x1xf32>
    %14 = vector.broadcast %6 : vector<16x1xf32> to vector<16x32xf32>
    %15 = arith.subf %0, %14 : vector<16x32xf32>
    %cst_8 = arith.constant 9.99999974E-6 : f32
    %16 = vector.broadcast %cst_8 : f32 to vector<16x1xf32>
    %17 = arith.addf %13, %16 : vector<16x1xf32>
    %18 = math.rsqrt %17 : vector<16x1xf32>
    %19 = vector.broadcast %18 : vector<16x1xf32> to vector<16x32xf32>
    %20 = arith.mulf %15, %19 : vector<16x32xf32>
    %21 = vector.broadcast %1 : vector<1x32xf32> to vector<16x32xf32>
    %22 = arith.mulf %20, %21 : vector<16x32xf32>
    %23 = vector.broadcast %2 : vector<1x32xf32> to vector<16x32xf32>
    %24 = arith.addf %22, %23 : vector<16x32xf32>
    %c0_9 = arith.constant 0 : index
    %c0_10 = arith.constant 0 : index
    %25 = vector.load %arg4[%c0_9, %c0_10] : memref<32x64xf32, #tpu.memory_space<vmem>>, vector<32x64xf32>
    %cst_11 = arith.constant dense<0.000000e+00> : vector<16x64xf32>
    %26 = tpu.matmul %24, %25, %cst_11 {dimension_numbers = #tpu.dot_dimension_numbers<[1], [0], [0], [1], [0, 0, 1, 1], [], []>} : vector<16x32xf32>, vector<32x64xf32>, vector<16x64xf32> -> vector<16x64xf32>
    %c0_12 = arith.constant 0 : index
    %c0_13 = arith.constant 0 : index
    %27 = vector.load %arg5[%c0_12, %c0_13] : memref<1x64xf32, #tpu.memory_space<vmem>>, vector<1x64xf32>
    %28 = vector.broadcast %27 : vector<1x64xf32> to vector<16x64xf32>
    %29 = arith.addf %26, %28 : vector<16x64xf32>
    %30 = arith.negf %29 : vector<16x64xf32>
    %31 = math.exp %30 : vector<16x64xf32>
    %cst_14 = arith.constant 1.000000e+00 : f32
    %32 = vector.broadcast %cst_14 : f32 to vector<16x64xf32>
    %33 = arith.addf %32, %31 : vector<16x64xf32>
    %34 = arith.divf %32, %33 : vector<16x64xf32>
    %35 = arith.mulf %29, %34 : vector<16x64xf32>
    %c0_15 = arith.constant 0 : index
    %c0_16 = arith.constant 0 : index
    %36 = vector.load %arg6[%c0_15, %c0_16] : memref<64x32xf32, #tpu.memory_space<vmem>>, vector<64x32xf32>
    %cst_17 = arith.constant dense<0.000000e+00> : vector<16x32xf32>
    %37 = tpu.matmul %35, %36, %cst_17 {dimension_numbers = #tpu.dot_dimension_numbers<[1], [0], [0], [1], [0, 0, 1, 1], [], []>} : vector<16x64xf32>, vector<64x32xf32>, vector<16x32xf32> -> vector<16x32xf32>
    %38 = arith.addf %0, %37 : vector<16x32xf32>
    %c0_18 = arith.constant 0 : index
    %c0_19 = arith.constant 0 : index
    %39 = vector.load %arg7[%c0_18, %c0_19] : memref<1x32xf32, #tpu.memory_space<vmem>>, vector<1x32xf32>
    %40 = vector.broadcast %39 : vector<1x32xf32> to vector<16x32xf32>
    %41 = arith.addf %38, %40 : vector<16x32xf32>
    %c0_20 = arith.constant 0 : index
    %c0_21 = arith.constant 0 : index
    %42 = vector.load %arg8[%c0_20, %c0_21] : memref<16x32xf32, #tpu.memory_space<vmem>>, vector<16x32xf32>
    tpu.vector_store %arg8[%c0_20, %c0_21], %41 {strides = array<i32>} : memref<16x32xf32, #tpu.memory_space<vmem>>, vector<16x32xf32>,
    return
  }
  func.func @transform_0(%arg0: i32) -> (i32, i32) {
    %c0_i32 = arith.constant 0 : i32
    %c0_i32_0 = arith.constant 0 : i32
    return %arg0, %c0_i32 : i32, i32
  }
  func.func @transform_1(%arg0: i32) -> (i32, i32) {
    %c0_i32 = arith.constant 0 : i32
    %c0_i32_0 = arith.constant 0 : i32
    %c0_i32_1 = arith.constant 0 : i32
    return %c0_i32, %c0_i32_0 : i32, i32
  }
  func.func @transform_2(%arg0: i32) -> (i32, i32) {
    %c0_i32 = arith.constant 0 : i32
    %c0_i32_0 = arith.constant 0 : i32
    %c0_i32_1 = arith.constant 0 : i32
    return %c0_i32, %c0_i32_0 : i32, i32
  }
  func.func @transform_3(%arg0: i32) -> (i32, i32) {
    %c0_i32 = arith.constant 0 : i32
    %c0_i32_0 = arith.constant 0 : i32
    %c0_i32_1 = arith.constant 0 : i32
    return %c0_i32, %c0_i32_0 : i32, i32
  }
  func.func @transform_4(%arg0: i32) -> (i32, i32) {
    %c0_i32 = arith.constant 0 : i32
    %c0_i32_0 = arith.constant 0 : i32
    %c0_i32_1 = arith.constant 0 : i32
    return %c0_i32, %c0_i32_0 : i32, i32
  }
  func.func @transform_5(%arg0: i32) -> (i32, i32) {
    %c0_i32 = arith.constant 0 : i32
    %c0_i32_0 = arith.constant 0 : i32
    %c0_i32_1 = arith.constant 0 : i32
    return %c0_i32, %c0_i32_0 : i32, i32
  }
  func.func @transform_6(%arg0: i32) -> (i32, i32) {
    %c0_i32 = arith.constant 0 : i32
    %c0_i32_0 = arith.constant 0 : i32
    %c0_i32_1 = arith.constant 0 : i32
    return %c0_i32, %c0_i32_0 : i32, i32
  }
  func.func @transform_7(%arg0: i32) -> (i32, i32) {
    %c0_i32 = arith.constant 0 : i32
    %c0_i32_0 = arith.constant 0 : i32
    return %arg0, %c0_i32 : i32, i32
  }
}

module attributes {stable_mosaic.version = 11 : i64} {
  func.func @ln_ffn_residual_kernel(%arg0: i32, %arg1: memref<16x32xf32, #tpu.memory_space<vmem>>, %arg2: memref<1x32xf32, #tpu.memory_space<vmem>>, %arg3: memref<1x32xf32, #tpu.memory_space<vmem>>, %arg4: memref<32x64xf32, #tpu.memory_space<vmem>>, %arg5: memref<1x64xf32, #tpu.memory_space<vmem>>, %arg6: memref<64x32xf32, #tpu.memory_space<vmem>>, %arg7: memref<1x32xf32, #tpu.memory_space<vmem>>, %arg8: memref<16x32xf32, #tpu.memory_space<vmem>>) attributes {dimension_semantics = [#tpu.dimension_semantics<parallel>], iteration_bounds = array<i64: 1>, scalar_prefetch = 0 : i64, scratch_operands = 0 : i64, tpu.core_type = #tpu.core_type<tc>, window_params = [{transform_indices = @transform_0, window_bounds = array<i64: 16, 32>}, {pipeline_mode = #tpu.pipeline_mode<synchronous>, transform_indices = @transform_1, window_bounds = array<i64: 1, 32>}, {pipeline_mode = #tpu.pipeline_mode<synchronous>, transform_indices = @transform_2, window_bounds = array<i64: 1, 32>}, {pipeline_mode = #tpu.pipeline_mode<synchronous>, transform_indices = @transform_3, window_bounds = array<i64: 32, 64>}, {pipeline_mode = #tpu.pipeline_mode<synchronous>, transform_indices = @transform_4, window_bounds = array<i64: 1, 64>}, {pipeline_mode = #tpu.pipeline_mode<synchronous>, transform_indices = @transform_5, window_bounds = array<i64: 64, 32>}, {pipeline_mode = #tpu.pipeline_mode<synchronous>, transform_indices = @transform_6, window_bounds = array<i64: 1, 32>}, {transform_indices = @transform_7, window_bounds = array<i64: 16, 32>}]} {
    %c0 = arith.constant 0 : index
    %c0_0 = arith.constant 0 : index
    %0 = vector.load %arg1[%c0, %c0_0] : memref<16x32xf32, #tpu.memory_space<vmem>>, vector<16x32xf32>
    %c0_1 = arith.constant 0 : index
    %c0_2 = arith.constant 0 : index
    %1 = vector.load %arg2[%c0_1, %c0_2] : memref<1x32xf32, #tpu.memory_space<vmem>>, vector<1x32xf32>
    %c0_3 = arith.constant 0 : index
    %c0_4 = arith.constant 0 : index
    %2 = vector.load %arg3[%c0_3, %c0_4] : memref<1x32xf32, #tpu.memory_space<vmem>>, vector<1x32xf32>
    %cst = arith.constant dense<0.000000e+00> : vector<16xf32>
    %3 = vector.multi_reduction <add>, %0, %cst [1] : vector<16x32xf32> to vector<16xf32>
    %4 = vector.shape_cast %3 : vector<16xf32> to vector<16x1xf32>
    %cst_5 = arith.constant 3.200000e+01 : f32
    %5 = vector.broadcast %cst_5 : f32 to vector<16x1xf32>
    %6 = arith.divf %4, %5 : vector<16x1xf32>
    %7 = vector.broadcast %6 : vector<16x1xf32> to vector<16x32xf32>
    %8 = arith.subf %0, %7 : vector<16x32xf32>
    %9 = arith.mulf %8, %8 : vector<16x32xf32>
    %cst_6 = arith.constant dense<0.000000e+00> : vector<16xf32>
    %10 = vector.multi_reduction <add>, %9, %cst_6 [1] : vector<16x32xf32> to vector<16xf32>
    %11 = vector.shape_cast %10 : vector<16xf32> to vector<16x1xf32>
    %cst_7 = arith.constant 3.200000e+01 : f32
    %12 = vector.broadcast %cst_7 : f32 to vector<16x1xf32>
    %13 = arith.divf %11, %12 : vector<16x1xf32>
    %14 = vector.broadcast %6 : vector<16x1xf32> to vector<16x32xf32>
    %15 = arith.subf %0, %14 : vector<16x32xf32>
    %cst_8 = arith.constant 9.99999974E-6 : f32
    %16 = vector.broadcast %cst_8 : f32 to vector<16x1xf32>
    %17 = arith.addf %13, %16 : vector<16x1xf32>
    %18 = math.rsqrt %17 : vector<16x1xf32>
    %19 = vector.broadcast %18 : vector<16x1xf32> to vector<16x32xf32>
    %20 = arith.mulf %15, %19 : vector<16x32xf32>
    %21 = vector.broadcast %1 : vector<1x32xf32> to vector<16x32xf32>
    %22 = arith.mulf %20, %21 : vector<16x32xf32>
    %23 = vector.broadcast %2 : vector<1x32xf32> to vector<16x32xf32>
    %24 = arith.addf %22, %23 : vector<16x32xf32>
    %c0_9 = arith.constant 0 : index
    %c0_10 = arith.constant 0 : index
    %25 = vector.load %arg4[%c0_9, %c0_10] : memref<32x64xf32, #tpu.memory_space<vmem>>, vector<32x64xf32>
    %cst_11 = arith.constant dense<0.000000e+00> : vector<16x64xf32>
    %26 = tpu.matmul %24, %25, %cst_11 {dimension_numbers = #tpu.dot_dimension_numbers<[1], [0], [0], [1], [0, 0, 1, 1], [], []>} : vector<16x32xf32>, vector<32x64xf32>, vector<16x64xf32> -> vector<16x64xf32>
    %c0_12 = arith.constant 0 : index
    %c0_13 = arith.constant 0 : index
    %27 = vector.load %arg5[%c0_12, %c0_13] : memref<1x64xf32, #tpu.memory_space<vmem>>, vector<1x64xf32>
    %28 = vector.broadcast %27 : vector<1x64xf32> to vector<16x64xf32>
    %29 = arith.addf %26, %28 : vector<16x64xf32>
    %30 = arith.negf %29 : vector<16x64xf32>
    %31 = math.exp %30 : vector<16x64xf32>
    %cst_14 = arith.constant 1.000000e+00 : f32
    %32 = vector.broadcast %cst_14 : f32 to vector<16x64xf32>
    %33 = arith.addf %32, %31 : vector<16x64xf32>
    %34 = arith.divf %32, %33 : vector<16x64xf32>
    %35 = arith.mulf %29, %34 : vector<16x64xf32>
    %c0_15 = arith.constant 0 : index
    %c0_16 = arith.constant 0 : index
    %36 = vector.load %arg6[%c0_15, %c0_16] : memref<64x32xf32, #tpu.memory_space<vmem>>, vector<64x32xf32>
    %cst_17 = arith.constant dense<0.000000e+00> : vector<16x32xf32>
    %37 = tpu.matmul %35, %36, %cst_17 {dimension_numbers = #tpu.dot_dimension_numbers<[1], [0], [0], [1], [0, 0, 1, 1], [], []>} : vector<16x64xf32>, vector<64x32xf32>, vector<16x32xf32> -> vector<16x32xf32>
    %38 = arith.addf %0, %37 : vector<16x32xf32>
    %c0_18 = arith.constant 0 : index
    %c0_19 = arith.constant 0 : index
    %39 = vector.load %arg7[%c0_18, %c0_19] : memref<1x32xf32, #tpu.memory_space<vmem>>, vector<1x32xf32>
    %40 = vector.broadcast %39 : vector<1x32xf32> to vector<16x32xf32>
    %41 = arith.addf %38, %40 : vector<16x32xf32>
    %c0_20 = arith.constant 0 : index
    %c0_21 = arith.constant 0 : index
    %42 = vector.load %arg8[%c0_20, %c0_21] : memref<16x32xf32, #tpu.memory_space<vmem>>, vector<16x32xf32>
    tpu.vector_store %arg8[%c0_20, %c0_21], %41 {strides = array<i32>} : memref<16x32xf32, #tpu.memory_space<vmem>>, vector<16x32xf32>,
    return
  }
  func.func @transform_0(%arg0: i32) -> (i32, i32) {
    %c0_i32 = arith.constant 0 : i32
    %c0_i32_0 = arith.constant 0 : i32
    return %arg0, %c0_i32 : i32, i32
  }
  func.func @transform_1(%arg0: i32) -> (i32, i32) {
    %c0_i32 = arith.constant 0 : i32
    %c0_i32_0 = arith.constant 0 : i32
    %c0_i32_1 = arith.constant 0 : i32
    return %c0_i32, %c0_i32_0 : i32, i32
  }
  func.func @transform_2(%arg0: i32) -> (i32, i32) {
    %c0_i32 = arith.constant 0 : i32
    %c0_i32_0 = arith.constant 0 : i32
    %c0_i32_1 = arith.constant 0 : i32
    return %c0_i32, %c0_i32_0 : i32, i32
  }
  func.func @transform_3(%arg0: i32) -> (i32, i32) {
    %c0_i32 = arith.constant 0 : i32
    %c0_i32_0 = arith.constant 0 : i32
    %c0_i32_1 = arith.constant 0 : i32
    return %c0_i32, %c0_i32_0 : i32, i32
  }
  func.func @transform_4(%arg0: i32) -> (i32, i32) {
    %c0_i32 = arith.constant 0 : i32
    %c0_i32_0 = arith.constant 0 : i32
    %c0_i32_1 = arith.constant 0 : i32
    return %c0_i32, %c0_i32_0 : i32, i32
  }
  func.func @transform_5(%arg0: i32) -> (i32, i32) {
    %c0_i32 = arith.constant 0 : i32
    %c0_i32_0 = arith.constant 0 : i32
    %c0_i32_1 = arith.constant 0 : i32
    return %c0_i32, %c0_i32_0 : i32, i32
  }
  func.func @transform_6(%arg0: i32) -> (i32, i32) {
    %c0_i32 = arith.constant 0 : i32
    %c0_i32_0 = arith.constant 0 : i32
    %c0_i32_1 = arith.constant 0 : i32
    return %c0_i32, %c0_i32_0 : i32, i32
  }
  func.func @transform_7(%arg0: i32) -> (i32, i32) {
    %c0_i32 = arith.constant 0 : i32
    %c0_i32_0 = arith.constant 0 : i32
    return %arg0, %c0_i32 : i32, i32
  }
}

</mosaic_0001>

<bundles_post_ra>
// kernel: encoder_ssm.11
= control target key start
LH: loop header
LB: loop body
LE: loop exit
PB: predicated region body
PF: predicated region fallthrough
CT: control target
= control target key end

     0   :  { %vm25_vm0 = vcmask 130048   ;;  %vm107_vm1 = vcmask 261120   ;;  %s173_s1 = inlined_call_operand.vmem [shape: f32[16,32], index: 1, kind: input, shape index: {}]   ;;  %s174_s0 = inlined_call_operand.vmem [shape: f32[16,16], index: 0, kind: input, shape index: {}]   ;;  %s175_s2 = inlined_call_operand.vmem [shape: f32[1,32], index: 2, kind: input, shape index: {}]   ;;  %s176_s3 = inlined_call_operand.vmem [shape: f32[16,32], index: 3, kind: output, shape index: {}]  }
   0x1   :  { %v16_v0 = vld [vmem:[%s173_s1] sm:$0xff]  ;;  %v17_v1 = vld [vmem:[%s173_s1 + $0x8] sm:$0xff] }
   0x2   :  { %v14_v2 = vld [vmem:[%s174_s0] sm:$0xff]  ;;  %v128_v3 = vpack.c.bf16 %v17_v1, %v16_v0  ;;  %v15_v4 = vld [vmem:[%s174_s0 + $0x8] sm:$0xff] }
   0x3   :  { %125 = vmatprep.mubr.msk.f32.mxu0 %vm25_vm0, %v14_v2  ;;  %v114_v5 = vld [vmem:[%s175_s2] ss:$0 sm:$0xff] }
   0x4   :  { %129 = vmatprep.subr.bf16.mxu0 %v128_v3 }
   0x5   :  { %131 = vmatpush3.bf16.msra.mxu0 %v128_v3 }
   0x8   :  { %126 = vmatmul.mubr.msk.f32.vlgmr.msra.gmra.mrb[0].mxu0 %vm25_vm0, %v15_v4 }
  0xdb   :  { %v127_v6 = vpop.f32.mrb[0].mxu0 }
  0xdc   :  { %v104_v7 = vadd.f32 %v127_v6, %v114_v5  ;;  %v98_v8 = vpop.f32.mrb[1].mxu0 }
  0xdd   :  { %v99_v9 = vadd.f32 %v114_v5, %v98_v8 }
  0xde   :  { %109 = vst.msk [vmem:[%s176_s3 + $0x8] sm:$0xff] %vm107_vm1, %v104_v7 }
  0xdf   :  { %108 = vst.msk [vmem:[%s176_s3] sm:$0xff] %vm107_vm1, %v99_v9 }

// kernel: encoder_ssm.12
= control target key start
LH: loop header
LB: loop body
LE: loop exit
PB: predicated region body
PF: predicated region fallthrough
CT: control target
= control target key end

     0   :  { %vm32_vm0 = vcmask 261120   ;;  %vm168_vm1 = vcmask 523264   ;;  %s436_s0 = inlined_call_operand.vmem [shape: f32[16,32], index: 0, kind: input, shape index: {}]   ;;  %s437_s3 = inlined_call_operand.vmem [shape: f32[32,64], index: 3, kind: input, shape index: {}]   ;;  %s438_s5 = inlined_call_operand.vmem [shape: f32[32,64], index: 5, kind: input, shape index: {}]   ;;  %s439_s1 = inlined_call_operand.vmem [shape: f32[1,32], index: 1, kind: input, shape index: {}]   ;;  %s440_s2 = inlined_call_operand.vmem [shape: f32[1,32], index: 2, kind: input, shape index: {}]   ;;  %s441_s4 = inlined_call_operand.vmem [shape: f32[1,64], index: 4, kind: input, shape index: {}]   ;;  %s442_s6 = inlined_call_operand.vmem [shape: f32[1,64], index: 6, kind: input, shape index: {}]   ;;  %s443_s7 = inlined_call_operand.vmem [shape: f32[16,64], index: 7, kind: output, shape index: {0}]   ;;  %s444_s8 = inlined_call_operand.vmem [shape: f32[16,64], index: 8, kind: output, shape index: {1}]  }
   0x1   :  { %v28_v0 = vld [vmem:[%s436_s0] sm:$0xff]  ;;  %v29_v1 = vld [vmem:[%s436_s0 + $0x8] sm:$0xff]  ;;  %v78_v19 = vld [vmem:[%s437_s3 + $0x10] sm:$0xff] }
   0x2   :  { %v33_v2 = vsel %vm32_vm0, %v28_v0, 0.0  ;;  %v36_v3 = vsel %vm32_vm0, %v29_v1, 0.0  ;;  %v76_v14 = vld [vmem:[%s437_s3] sm:$0xff]  ;;  %v77_v15 = vld [vmem:[%s437_s3 + $0x8] sm:$0xff]  ;;  %v79_v20 = vld [vmem:[%s437_s3 + $0x18] sm:$0xff] }
   0x3   :  { %34 = vadd.xlane.f32.xlu0 %v33_v2  ;;  %v171_v16 = vld [vmem:[%s438_s5] sm:$0xff]  ;;  %v309_v17 = vpack.c.bf16 %v77_v15, %v76_v14  ;;  %v172_v18 = vld [vmem:[%s438_s5 + $0x8] sm:$0xff]  ;;  %v313_v22 = vpack.c.bf16 %v79_v20, %v78_v19  ;;  %v173_v23 = vld [vmem:[%s438_s5 + $0x10] sm:$0xff] }
   0x4   :  { %v317_v21 = vpack.c.bf16 %v172_v18, %v171_v16  ;;  %v174_v24 = vld [vmem:[%s438_s5 + $0x18] sm:$0xff]  ;;  %v267_v33 = vld [vmem:[%s439_s1] ss:$0 sm:$0xff] }
   0x5   :  { %310 = vmatprep.subr.bf16.mxu0 %v309_v17  ;;  %v321_v25 = vpack.c.bf16 %v174_v24, %v173_v23  ;;  %v268_v35 = vld [vmem:[%s440_s2] ss:$0 sm:$0xff] }
   0x6   :  { %318 = vmatprep.subr.bf16.mxu1 %v317_v21  ;;  %312 = vmatpush3.bf16.msra.mxu0 %v309_v17  ;;  %v269_v42 = vld [vmem:[%s441_s4] ss:$0 sm:$0xff] }
   0x7   :  { %37 = vadd.xlane.f32.xlu0 %v36_v3  ;;  %320 = vmatpush3.bf16.msra.mxu1 %v317_v21  ;;  %v272_v43 = vld [vmem:[%s442_s6] ss:$0 sm:$0xff] }
   0x8   :  { %314 = vmatprep.subr.bf16.mxu0 %v313_v22  ;;  %322 = vmatprep.subr.bf16.mxu1 %v321_v25 }
   0xa   :  { %316 = vmatpush3.bf16.msra.mxu0 %v313_v22 }
   0xb   :  { %324 = vmatpush3.bf16.msra.mxu1 %v321_v25 }
  0x90   :  { %v35_v4 = vpop.xlane.xlu0 %34 }
  0x91   :  { %v40_v5 = vmul.f32 0.03125, %v35_v4 }
  0x93   :  { %v42_v6 = vsub.f32 %v28_v0, %v40_v5 }
  0x94   :  { %v38_v7 = vpop.xlane.xlu0 %37 }
  0x95   :  { %v41_v8 = vmul.f32 0.03125, %v38_v7  ;;  %v44_v9 = vmul.f32 %v42_v6, %v42_v6 }
  0x97   :  { %v43_v10 = vsub.f32 %v29_v1, %v41_v8  ;;  %v46_v11 = vsel %vm32_vm0, %v44_v9, 0.0 }
  0x98   :  { %47 = vadd.xlane.f32.xlu1 %v46_v11 }
  0x99   :  { %v45_v12 = vmul.f32 %v43_v10, %v43_v10 }
  0x9b   :  { %v49_v13 = vsel %vm32_vm0, %v45_v12, 0.0 }
  0x9c   :  { %50 = vadd.xlane.f32.xlu1 %v49_v13 }
 0x125   :  { %v48_v26 = vpop.xlane.xlu1 %47 }
 0x126   :  { %v52_v27 = vmul.f32 0.03125, %v48_v26 }
 0x128   :  { %v54_v28 = vadd.f32 1e-05, %v52_v27 }
 0x129   :  { %v51_v29 = vpop.xlane.xlu1 %50 }
 0x12a   :  { %325 = vrsqrt.f32 %v54_v28  ;;  %v53_v30 = vmul.f32 0.03125, %v51_v29 }
 0x12c   :  { %v55_v31 = vadd.f32 1e-05, %v53_v30 }
 0x12e   :  { %327 = vrsqrt.f32 %v55_v31 }
 0x134   :  { %v326_v32 = vpop.eup %325 }
 0x135   :  { %v58_v34 = vmul.f32 %v326_v32, %v42_v6 }
 0x137   :  { %v66_v36 = vmul.f32 %v267_v33, %v58_v34 }
 0x138   :  { %v328_v37 = vpop.eup %327 }
 0x139   :  { %v59_v38 = vmul.f32 %v328_v37, %v43_v10  ;;  %v74_v39 = vadd.f32 %v268_v35, %v66_v36 }
 0x13b   :  { %v67_v40 = vmul.f32 %v267_v33, %v59_v38  ;;  %295 = vmatprep.mubr.msk.f32.mxu0 %vm32_vm0, %v74_v39  ;;  %306 = vmatprep.mubr.msk.f32.mxu1 %vm32_vm0, %v74_v39 }
 0x13d   :  { %v75_v41 = vadd.f32 %v268_v35, %v67_v40 }
 0x13f   :  { %296 = vmatmul.mubr.msk.f32.vlgmr.msra.gmra.mrb[0].mxu0 %vm32_vm0, %v75_v41  ;;  %307 = vmatmul.mubr.msk.f32.vlgmr.msra.gmra.mrb[0].mxu1 %vm32_vm0, %v75_v41 }
 0x212   :  { %v297_v44 = vpop.f32.mrb[0].mxu0  ;;  %v308_v45 = vpop.f32.mrb[0].mxu1 }
 0x213   :  { %v165_v46 = vadd.f32 %v297_v44, %v269_v42  ;;  %v254_v47 = vadd.f32 %v308_v45, %v272_v43  ;;  %v159_v48 = vpop.f32.mrb[1].mxu0  ;;  %v248_v49 = vpop.f32.mrb[1].mxu1 }
 0x214   :  { %v160_v50 = vadd.f32 %v269_v42, %v159_v48  ;;  %v249_v51 = vadd.f32 %v272_v43, %v248_v49 }
 0x215   :  { %170 = vst.msk [vmem:[%s443_s7 + $0x8] sm:$0xff] %vm168_vm1, %v165_v46  ;;  %258 = vst.msk [vmem:[%s444_s8 + $0x8] sm:$0xff] %vm168_vm1, %v254_v47 }
 0x216   :  { %169 = vst.msk [vmem:[%s443_s7] sm:$0xff] %vm168_vm1, %v160_v50  ;;  %257 = vst.msk [vmem:[%s444_s8] sm:$0xff] %vm168_vm1, %v249_v51 }

// kernel: encoder_ssm.13
= control target key start
LH: loop header
LB: loop body
LE: loop exit
PB: predicated region body
PF: predicated region fallthrough
CT: control target
= control target key end

     0   :  { %s884_s30 = smov 0   ;;  %s987_s0 = inlined_call_operand.vmem [shape: f32[2,8,64], index: 0, kind: input, shape index: {}]   ;;  %s988_s1 = inlined_call_operand.vmem [shape: f32[4,64], index: 1, kind: input, shape index: {}]   ;;  %s989_s2 = inlined_call_operand.vmem [shape: f32[1,64], index: 2, kind: input, shape index: {}]   ;;  %s990_s3 = inlined_call_operand.vmem [shape: f32[64,64], index: 3, kind: input, shape index: {}]   ;;  %s991_s4 = inlined_call_operand.vmem [shape: f32[1,64], index: 4, kind: input, shape index: {}]   ;;  %s992_s5 = inlined_call_operand.vmem [shape: f32[64,16], index: 5, kind: input, shape index: {}]   ;;  %s993_s6 = inlined_call_operand.vmem [shape: f32[1,16], index: 6, kind: input, shape index: {}]   ;;  %s994_s7 = inlined_call_operand.vmem [shape: f32[2,8,64], index: 7, kind: output, shape index: {0}]   ;;  %s995_s8 = inlined_call_operand.vmem [shape: f32[2,8,64], index: 8, kind: output, shape index: {1}]   ;;  %s996_s9 = inlined_call_operand.vmem [shape: f32[2,8,16], index: 9, kind: output, shape index: {2}]  }
   0x1 LB: > { %s711_s10 = sadd.s32 4294967295, %s829_s30   ;;  %p715_p0 = scmp.ge.s32.totalorder %s829_s30, 1  ;;  %s829_s30 = sphi %s884_s30, %s20_s30  }
   0x2   : > { %p291_p1 = scmp.lt.s32.totalorder %s829_s30, 3 }
   0x4   : > { %p292_p2 = pnand %p715_p0, %p291_p1 }
   0x5   : > { %v420_v0 = vld [vmem:[%s990_s3] sm:$0xff] (!%p292_p2)  ;;  %v421_v1 = vld [vmem:[%s990_s3 + $0x8] sm:$0xff] (!%p292_p2)  ;;  %v356_v3 = vlaneseq (!%p292_p2)  ;;  %v831_v4 = vmov (!%p292_p2), 0.0|0.0   ;;  %v422_v7 = vld [vmem:[%s990_s3 + $0x10] sm:$0xff] (!%p292_p2)  ;;  %p333_p3 = scmp.lt.s32.totalorder (!%p292_p2), %s711_s10, 1  ;;  %vm832_vm0 = vmmov (!%p292_p2), 0  }
   0x6   : > { %295 = sbr.rel (%p292_p2) target bundleno = 277 (0x115), region = 48  ;;  %v509_v2 = vld [vmem:[%s992_s5] sm:$0xff] (!%p292_p2)  ;;  %784 = vmatprep.subr.bf16.mxu0 (!%p292_p2), %v831_v4  ;;  %796 = vmatprep.subr.bf16.mxu1 (!%p292_p2), %v831_v4  ;;  %v785_v5 = vpack.c.bf16 (!%p292_p2), %v421_v1, %v420_v0  ;;  %v510_v6 = vld [vmem:[%s992_s5 + $0x8] sm:$0xff] (!%p292_p2)  ;;  %v423_v8 = vld [vmem:[%s990_s3 + $0x18] sm:$0xff] (!%p292_p2)  ;;  %v833_v12 = vmov (!%p292_p2), 0.0   ;;  %vm354_vm1 = vcmask (!%p292_p2), 1042432  }
   0x7   : > { %v797_v9 = vpack.c.bf16 (!%p292_p2), %v510_v6, %v509_v2  ;;  %v511_v10 = vld [vmem:[%s992_s5 + $0x10] sm:$0xff] (!%p292_p2)  ;;  %v512_v11 = vld [vmem:[%s992_s5 + $0x18] sm:$0xff] (!%p292_p2)  ;;  %762 = vmatprep.mubr.msk.f32.mxu0 (!%p292_p2), %vm832_vm0, %v833_v12  ;;  %781 = vmatprep.mubr.msk.f32.mxu1 (!%p292_p2), %vm832_vm0, %v833_v12  ;;  %v357_v13 = vshrl.u32 (!%p292_p2), %v356_v3, 7  ;;  %v788_v14 = vpack.c.bf16 (!%p292_p2), %v423_v8, %v422_v7  ;;  %v424_v16 = vld [vmem:[%s990_s3 + $0x20] sm:$0xff] (!%p292_p2)  ;;  %vm369_vm2 = vcmask (!%p292_p2), 1046528  }
   0x8   : > { %786 = vmatpush3.bf16.msra.mxu0 (!%p292_p2), %v785_v5  ;;  %v800_v15 = vpack.c.bf16 (!%p292_p2), %v512_v11, %v511_v10  ;;  %v425_v17 = vld [vmem:[%s990_s3 + $0x28] sm:$0xff] (!%p292_p2)  ;;  %v513_v18 = vld [vmem:[%s992_s5 + $0x20] sm:$0xff] (!%p292_p2)  ;;  %v426_v31 = vld [vmem:[%s990_s3 + $0x30] sm:$0xff] (!%p292_p2)  ;;  %vm383_vm3 = vcmask (!%p292_p2), 1045504   ;;  %vm397_vm4 = vcmask (!%p292_p2), 1044480   ;;  %vm418_vm5 = vcmask (!%p292_p2), 523264  }
   0x9   : > { %798 = vmatpush3.bf16.msra.mxu1 (!%p292_p2), %v797_v9  ;;  %787 = vmatprep.subr.bf16.mxu0 (!%p292_p2), %v831_v4  ;;  %v358_v19 = vsub.s32 (!%p292_p2), 0, %v357_v13  ;;  %v363_v20 = vsub.s32 (!%p292_p2), 1, %v357_v13  ;;  %v514_v21 = vld [vmem:[%s992_s5 + $0x28] sm:$0xff] (!%p292_p2)  ;;  %v350_v22 = vld [vmem:[%s988_s1] sm:$0xf] (!%p292_p2)  ;;  %v377_v23 = vsub.s32 (!%p292_p2), 2, %v357_v13  ;;  %v791_v26 = vpack.c.bf16 (!%p292_p2), %v425_v17, %v424_v16 }
   0xa   : > { %799 = vmatprep.subr.bf16.mxu1 (!%p292_p2), %v831_v4  ;;  %v391_v24 = vsub.s32 (!%p292_p2), 3, %v357_v13  ;;  %v803_v30 = vpack.c.bf16 (!%p292_p2), %v514_v21, %v513_v18  ;;  %v427_v32 = vld [vmem:[%s990_s3 + $0x38] sm:$0xff] (!%p292_p2)  ;;  %v515_v35 = vld [vmem:[%s992_s5 + $0x30] sm:$0xff] (!%p292_p2)  ;;  %v720_v58 = vld [vmem:[%s989_s2] ss:$0 sm:$0xff] (!%p292_p2)  ;;  %vm594_vm6 = vcmask (!%p292_p2), 130048  }
   0xb   : > { %v364_v25 = vrot.slane (!%p292_p2), %v350_v22, %v363_v20  ;;  %v378_v28 = vrot.slane (!%p292_p2), %v350_v22, %v377_v23  ;;  %v359_v34 = vrot.slane (!%p292_p2), %v350_v22, %v358_v19  ;;  %v516_v36 = vld [vmem:[%s992_s5 + $0x38] sm:$0xff] (!%p292_p2)  ;;  %v794_v41 = vpack.c.bf16 (!%p292_p2), %v427_v32, %v426_v31  ;;  %v722_v2 = vld [vmem:[%s991_s4] ss:$0 sm:$0xff] (!%p292_p2) }
   0xc   : > { %789 = vmatpush3.bf16.msra.mxu0 (!%p292_p2), %v788_v14  ;;  %v392_v29 = vrot.slane (!%p292_p2), %v350_v22, %v391_v24  ;;  %v806_v45 = vpack.c.bf16 (!%p292_p2), %v516_v36, %v515_v35  ;;  %v724_v3 = vld [vmem:[%s993_s6] ss:$0 sm:$0xff] (!%p292_p2) }
   0xd   : > { %s998_s10 = smov (!%p333_p3, %s711_s10), 1  ;;  %801 = vmatpush3.bf16.msra.mxu1 %v800_v15  ;;  %790 = vmatprep.subr.bf16.mxu0 %v831_v4 }
   0xe   : > { %s932_s16 = sshll.u32 %s998_s10, 3  ;;  %802 = vmatprep.subr.bf16.mxu1 %v831_v4 }
   0xf   : > { %s336_s21 = scalar_lea.vmem %s987_s0, %s932_s16  ;;  %s340_s14 = scalar_lea.vmem %s994_s7, %s932_s16 }
  0x10   : > { %v349_v27 = vld [vmem:[%s336_s21] sm:$0xff]  ;;  %792 = vmatpush3.bf16.msra.mxu0 %v791_v26  ;;  %s344_s10 = scalar_lea.vmem %s995_s8, %s932_s16  ;;  %s348_s24 = scalar_lea.vmem %s996_s9, %s932_s16 }
  0x11   : > { %v352_v33 = vrot.slane %v349_v27, 5  ;;  %804 = vmatpush3.bf16.msra.mxu1 %v803_v30  ;;  %793 = vmatprep.subr.bf16.mxu0 %v831_v4 }
  0x12   : > { %805 = vmatprep.subr.bf16.mxu1 %v831_v4 }
  0x13   : > { %v355_v37 = vsel %vm354_vm1, 0.0, %v352_v33  ;;  %v366_v38 = vmul.f32 %v364_v25, %v352_v33  ;;  %v380_v39 = vmul.f32 %v378_v28, %v352_v33  ;;  %v394_v40 = vmul.f32 %v392_v29, %v352_v33 }
  0x14   : > { %v365_v42 = vmul.f32 %v364_v25, %v355_v37  ;;  %v379_v43 = vmul.f32 %v378_v28, %v355_v37  ;;  %v393_v44 = vmul.f32 %v392_v29, %v355_v37  ;;  %v360_v46 = vmul.f32 %v359_v34, %v355_v37  ;;  %795 = vmatpush3.bf16.msra.mxu0 %v794_v41 }
  0x15   : > { %v371_v47 = vrot.slane %v366_v38, 1  ;;  %v385_v48 = vrot.slane %v380_v39, 2  ;;  %v399_v52 = vrot.slane %v394_v40, 3  ;;  %807 = vmatpush3.bf16.msra.mxu1 %v806_v45 }
  0x16   : > { %v370_v49 = vrot.slane %v365_v42, 1  ;;  %v384_v50 = vrot.slane %v379_v43, 2  ;;  %v398_v51 = vrot.slane %v393_v44, 3 }
  0x18   : > { %v372_v53 = vsel %vm369_vm2, %v370_v49, %v371_v47  ;;  %v386_v54 = vsel %vm383_vm3, %v384_v50, %v385_v48  ;;  %v400_v56 = vsel %vm397_vm4, %v398_v51, %v399_v52 }
  0x19   : > { %v374_v55 = vadd.f32 %v372_v53, %v360_v46 }
  0x1b   : > { %v388_v57 = vadd.f32 %v386_v54, %v374_v55 }
  0x1d   : > { %v402_v59 = vadd.f32 %v400_v56, %v388_v57 }
  0x1f   : > { %v410_v60 = vadd.f32 %v720_v58, %v402_v59 }
  0x21   : > { %v721_v61 = vmul.f32 -1.442695, %v410_v60 }
  0x23   : > { %819 = vpow2.f32 %v721_v61 }
  0x2d   : > { %v820_v62 = vpop.eup %819 }
  0x2e   : > { %v414_v63 = vadd.f32 1.0, %v820_v62 }
  0x30   : > { %821 = vrcp.f32 %v414_v63 }
  0x3a   : > { %v822_v0 = vpop.eup %821 }
  0x3b   : > { %v417_v1 = vmul.f32 %v822_v0, %v410_v60 }
  0x3d   : > { %419 = vst.msk [vmem:[%s340_s14] sm:$0xff] %vm418_vm5, %v417_v1  ;;  %763 = vmatmul.mubr.msk.f32.vlgmr.msra.gmra.mrb[0].mxu0 %vm418_vm5, %v417_v1  ;;  %782 = vmatmul.mubr.msk.f32.vlgmr.msra.gmra.mrb[0].mxu1 %vm418_vm5, %v417_v1 }
 0x110   : > { %v504_v4 = vpop.f32.mrb[0].mxu0  ;;  %v590_v5 = vpop.f32.mrb[0].mxu1 }
 0x111   : > { %v505_v6 = vadd.f32 %v722_v2, %v504_v4  ;;  %v591_v7 = vadd.f32 %v724_v3, %v590_v5  ;;  %v764_v8 = vpop.f32.mrb[1].mxu0  ;;  %v783_v9 = vpop.f32.mrb[1].mxu1 }
 0x113   : > { %508 = vst.msk [vmem:[%s344_s10] sm:$0xff] %vm418_vm5, %v505_v6 }
 0x114   : > { %595 = vst.msk [vmem:[%s348_s24] sm:$0xff] %vm594_vm6, %v591_v7 }
 0x115 PF: > { %s20_s30 = sadd.s32 1, %s829_s30  }
 0x116   : > { %p17_p4 = scmp.ge.s32.totalorder %s20_s30, 4  }
 0x118   :  { %19 = sbr.rel (!%p17_p4) target bundleno = 1 (0x1), region = 102 }

// kernel: encoder_ssm.14
= control target key start
LH: loop header
LB: loop body
LE: loop exit
PB: predicated region body
PF: predicated region fallthrough
CT: control target
= control target key end

     0   :  { %s763_s21 = smov 0   ;;  %s765_s22 = smov 0   ;;  %s872_s0 = inlined_call_operand.vmem [shape: f32[2,8,64], index: 0, kind: input, shape index: {}]   ;;  %s873_s1 = inlined_call_operand.vmem [shape: f32[2,8,64], index: 1, kind: input, shape index: {}]   ;;  %s874_s2 = inlined_call_operand.vmem [shape: f32[2,8,64], index: 2, kind: input, shape index: {}]   ;;  %s875_s3 = inlined_call_operand.vmem [shape: f32[2,16,8], index: 3, kind: input, shape index: {}]   ;;  %s876_s4 = inlined_call_operand.vmem [shape: f32[8,64], index: 4, kind: input, shape index: {}]   ;;  %s877_s5 = inlined_call_operand.vmem [shape: f32[1,64], index: 5, kind: input, shape index: {}]   ;;  %s878_s6 = inlined_call_operand.vmem [shape: f32[2,8,64], index: 6, kind: output, shape index: {}]  }
   0x1   :  { %s767_s23 = smov 0  }
   0x2 LB: > { %s28_s24 = sadd.s32 1, %s713_s22  ;;  %p624_p0 = scmp.ge.s32.totalorder %s717_s23, 1  ;;  %s717_s23 = sphi %s767_s23, %s16_s23   ;;  %s713_s22 = sphi %s765_s22, %s880_s22   ;;  %s709_s21 = sphi %s763_s21, %s879_s21  }
   0x3   : > { %p30_p1 = scmp.ge.s32.totalorder %s28_s24, 2  ;;  %p285_p2 = scmp.lt.s32.totalorder %s717_s23, 3 }
   0x5   : > { %s882_s24 = smov (%p30_p1, %s28_s24), 0  ;;  %p286_p3 = pnand %p624_p0, %p285_p2 }
   0x6   : > { %p345_p4 = scmp.lt.s32.totalorder (!%p286_p3), %s709_s21, 1  ;;  %v784_v0 = vld [vmem:[%s876_s4] sm:$0xff] (!%p286_p3)  ;;  %v389_v2 = vlaneseq (!%p286_p3)  ;;  %v819_v6 = vmov (!%p286_p3), 0.0   ;;  %s821_s25 = smov (!%p286_p3), 0  }
   0x7   : > { %289 = sbr.rel (%p286_p3) target bundleno = 191 (0xbf), region = 44  ;;  %v789_v1 = vld [vmem:[%s877_s5] sm:$0x1] (!%p286_p3) }
   0x8   : > { %v792_v3 = vand.u32 (!%p286_p3), 127, %v389_v2 }
   0xe   : > { %s884_s21 = smov (!%p345_p4, %s709_s21), 1 }
   0xf   : > { %s794_s29 = sshll.u32 %s884_s21, 3  ;;  %s635_s30 = sshll.u32 %s884_s21, 4 }
  0x10   : > { %s351_s9 = scalar_lea.vmem %s872_s0, %s794_s29  ;;  %s358_s12 = scalar_lea.vmem %s873_s1, %s794_s29 }
  0x11   : > { %s365_s15 = scalar_lea.vmem %s874_s2, %s794_s29  ;;  %s370_s18 = scalar_lea.vmem %s875_s3, %s635_s30 }
  0x12   : > { %s384_s21 = scalar_lea.vmem %s878_s6, %s794_s29  ;;  %v815_v4 = vld [vmem:[%s370_s18] sm:$0xff]  ;;  %v817_v5 = vld [vmem:[%s370_s18 + $0x8] sm:$0xff] }
  0x13 LB: >> { %v410_v7 = vstv %s725_s25  ;;  %v727_v8 = vmov 0.0   ;;  %vm416_vm1 = vcmask 64512   ;;  %s400_s28 = scalar_lea.vmem %s358_s12, %s725_s25  ;;  %v424_v20 = vshrl.u32 %v389_v2, 7  ;;  %s449_s8 = scalar_lea.vmem %s365_s15, %s725_s25  ;;  %s725_s25 = sphi %s821_s25, %s396_s25   ;;  %v721_v6 = vphi %v819_v6, %v437_v6  }
  0x14   : >> { %vm411_vm0 = vcmp.eq.s32.totalorder %v792_v3, %v410_v7  ;;  %v401_v14 = vld [vmem:[%s400_s28] sm:$0x1]  ;;  %s398_s13 = scalar_lea.vmem %s351_s9, %s725_s25  ;;  %vm439_vm3 = vcmask 523264   ;;  %s459_s17 = scalar_lea.vmem %s384_s21, %s725_s25  ;;  %vm460_vm4 = vcmask 516096  }
  0x15   : >> { %v631_v9 = vsel %vm411_vm0, 1.0, %v727_v8  ;;  %v403_v15 = vmin.f32 %v401_v14, 20.0  ;;  %vm402_vm2 = vcmp.gt.f32.partialorder %v401_v14, 20.0  ;;  %v425_v22 = vsub.s32 0, %v424_v20  ;;  %v450_v26 = vld [vmem:[%s449_s8] sm:$0x1] }
  0x16   : >> { %v414_v10 = vmul.f32 %v631_v9, %v815_v4  ;;  %v415_v11 = vmul.f32 %v631_v9, %v817_v5  ;;  %v632_v28 = vmul.f32 -1.442695, %v450_v26  ;;  %v399_v29 = vld [vmem:[%s398_s13] sm:$0x1]  ;;  %s396_s25 = sadd.s32 1, %s725_s25  }
  0x17   : >> { %v404_v16 = vmul.f32 1.442695, %v403_v15  ;;  %v447_v46 = vmul.f32 %v399_v29, %v789_v1  ;;  %p393_p5 = scmp.ge.s32.totalorder %s396_s25, 8  }
  0x18   : >> { %v417_v12 = vsel %vm416_vm1, %v414_v10, 0.0  ;;  %v420_v13 = vsel %vm416_vm1, %v415_v11, 0.0 }
  0x19   : >> { %418 = vadd.xlane.f32.xlu0 %v417_v12  ;;  %677 = vpow2.f32 %v404_v16 }
  0x1d   : >> { %421 = vadd.xlane.f32.xlu0 %v420_v13 }
  0x23   : >> { %v678_v17 = vpop.eup %677 }
  0x24   : >> { %v406_v18 = vadd.f32 1.0, %v678_v17 }
  0x26   : >> { %679 = vlog2.f32 %v406_v18 }
  0x30   : >> { %v680_v19 = vpop.eup %679 }
  0x31   : >> { %v408_v21 = vmul.f32 0.6931472, %v680_v19 }
  0x33   : >> { %v409_v23 = vsel %vm402_vm2, %v401_v14, %v408_v21 }
  0x34   : >> { %v426_v24 = vrot.slane %v409_v23, %v425_v22  ;;  %v431_v30 = vmul.f32 %v409_v23, %v399_v29 }
  0x36   : >> { %v427_v25 = vmul.f32 %v426_v24, %v784_v0  ;;  %v435_v32 = vrot.slane %v431_v30, %v425_v22 }
  0x38   : >> { %v428_v27 = vmul.f32 1.442695, %v427_v25 }
  0x3a   : >> { %681 = vpow2.f32 %v428_v27 }
  0x3b   : >> { %683 = vpow2.f32 %v632_v28 }
  0x44   : >> { %v682_v31 = vpop.eup %681 }
  0x45   : >> { %v684_v33 = vpop.eup %683  ;;  %v430_v34 = vmul.f32 %v721_v6, %v682_v31 }
  0x46   : >> { %v454_v37 = vadd.f32 1.0, %v684_v33 }
  0x48   : >> { %685 = vrcp.f32 %v454_v37 }
  0x52   : >> { %v686_v45 = vpop.eup %685 }
  0x53   : >> { %v457_v48 = vmul.f32 %v686_v45, %v450_v26 }
  0xa6   : >> { %v419_v35 = vpop.xlane.xlu0 %418 }
  0xa7   : >> { %v436_v36 = vmul.f32 %v435_v32, %v419_v35 }
  0xa9   : >> { %v437_v6 = vadd.f32 %v436_v36, %v430_v34  }
  0xaa   : >> { %v422_v38 = vpop.xlane.xlu0 %421 }
  0xab   : >> { %v438_v39 = vmul.f32 %v437_v6, %v422_v38 }
  0xad   : >> { %v440_v40 = vsel %vm439_vm3, %v438_v39, 0.0 }
  0xae   : >> { %v441_v41 = vrot.slane %v440_v40, 4 }
  0xb0   : >> { %v442_v42 = vadd.f32 %v441_v41, %v440_v40 }
  0xb2   : >> { %v443_v43 = vrot.slane %v442_v42, 2 }
  0xb4   : >> { %v444_v44 = vadd.f32 %v443_v43, %v442_v42 }
  0xb6   : >> { %v445_v47 = vrot.slane %v444_v44, 1 }
  0xb8   : >> { %v446_v49 = vadd.f32 %v445_v47, %v444_v44  ;;  %395 = sbr.rel (!%p393_p5) target bundleno = 19 (0x13), region = 100 }
  0xba   : >> { %v448_v50 = vadd.f32 %v447_v46, %v446_v49 }
  0xbc   : >> { %v458_v51 = vmul.f32 %v457_v48, %v448_v50 }
  0xbe   : >> { %461 = vst.msk [vmem:[%s459_s17] sm:$0x1] %vm460_vm4, %v458_v51 }
  0xbf PF: > { %s16_s23 = sadd.s32 1, %s717_s23   ;;  %s879_s21 = smov %s713_s22 }
  0xc0   : > { %p13_p6 = scmp.ge.s32.totalorder %s16_s23, 4   ;;  %s880_s22 = smov %s882_s24 }
  0xc2   :  { %15 = sbr.rel (!%p13_p6) target bundleno = 2 (0x2), region = 111 }

// kernel: encoder_ssm.15
= control target key start
LH: loop header
LB: loop body
LE: loop exit
PB: predicated region body
PF: predicated region fallthrough
CT: control target
= control target key end

     0   :  { %vm29_vm0 = vcmask 523264   ;;  %vm122_vm1 = vcmask 261120   ;;  %s249_s2 = inlined_call_operand.vmem [shape: f32[64,32], index: 2, kind: input, shape index: {}]   ;;  %s250_s0 = inlined_call_operand.vmem [shape: f32[16,64], index: 0, kind: input, shape index: {}]   ;;  %s251_s1 = inlined_call_operand.vmem [shape: f32[16,32], index: 1, kind: input, shape index: {}]   ;;  %s252_s3 = inlined_call_operand.vmem [shape: f32[1,32], index: 3, kind: input, shape index: {}]   ;;  %s253_s4 = inlined_call_operand.vmem [shape: f32[16,32], index: 4, kind: output, shape index: {}]  }
   0x1   :  { %v21_v0 = vld [vmem:[%s249_s2] sm:$0xff]  ;;  %v22_v1 = vld [vmem:[%s249_s2 + $0x8] sm:$0xff]  ;;  %v23_v2 = vld [vmem:[%s249_s2 + $0x10] sm:$0xff] }
   0x2   :  { %v161_v3 = vpack.c.bf16 %v22_v1, %v21_v0  ;;  %v24_v4 = vld [vmem:[%s249_s2 + $0x18] sm:$0xff]  ;;  %v25_v6 = vld [vmem:[%s249_s2 + $0x20] sm:$0xff]  ;;  %v26_v7 = vld [vmem:[%s249_s2 + $0x28] sm:$0xff] }
   0x3   :  { %v165_v5 = vpack.c.bf16 %v24_v4, %v23_v2  ;;  %v19_v8 = vld [vmem:[%s250_s0] sm:$0xff]  ;;  %v169_v9 = vpack.c.bf16 %v26_v7, %v25_v6  ;;  %v27_v10 = vld [vmem:[%s249_s2 + $0x30] sm:$0xff]  ;;  %v28_v11 = vld [vmem:[%s249_s2 + $0x38] sm:$0xff] }
   0x4   :  { %162 = vmatprep.subr.bf16.mxu0 %v161_v3  ;;  %158 = vmatprep.mubr.msk.f32.mxu0 %vm29_vm0, %v19_v8  ;;  %v173_v12 = vpack.c.bf16 %v28_v11, %v27_v10  ;;  %v20_v13 = vld [vmem:[%s250_s0 + $0x8] sm:$0xff]  ;;  %v17_v15 = vld [vmem:[%s251_s1] sm:$0xff] }
   0x5   :  { %164 = vmatpush3.bf16.msra.mxu0 %v161_v3  ;;  %v18_v14 = vld [vmem:[%s251_s1 + $0x8] sm:$0xff]  ;;  %v131_v17 = vld [vmem:[%s252_s3] ss:$0 sm:$0xff] }
   0x6   :  { %166 = vmatprep.subr.bf16.mxu0 %v165_v5 }
   0x9   :  { %168 = vmatpush3.bf16.msra.mxu0 %v165_v5 }
   0xa   :  { %170 = vmatprep.subr.bf16.mxu0 %v169_v9 }
   0xd   :  { %172 = vmatpush3.bf16.msra.mxu0 %v169_v9 }
   0xe   :  { %174 = vmatprep.subr.bf16.mxu0 %v173_v12 }
  0x11   :  { %176 = vmatpush3.bf16.msra.mxu0 %v173_v12 }
  0x14   :  { %159 = vmatmul.mubr.msk.f32.vlgmr.msra.gmra.mrb[0].mxu0 %vm29_vm0, %v20_v13 }
  0xe7   :  { %v160_v16 = vpop.f32.mrb[0].mxu0 }
  0xe8   :  { %v112_v18 = vadd.f32 %v160_v16, %v18_v14  ;;  %v102_v19 = vpop.f32.mrb[1].mxu0 }
  0xe9   :  { %v111_v20 = vadd.f32 %v102_v19, %v17_v15 }
  0xea   :  { %v121_v21 = vadd.f32 %v131_v17, %v112_v18 }
  0xeb   :  { %v120_v22 = vadd.f32 %v131_v17, %v111_v20 }
  0xec   :  { %124 = vst.msk [vmem:[%s253_s4 + $0x8] sm:$0xff] %vm122_vm1, %v121_v21 }
  0xed   :  { %123 = vst.msk [vmem:[%s253_s4] sm:$0xff] %vm122_vm1, %v120_v22 }

// kernel: encoder_ssm.16
= control target key start
LH: loop header
LB: loop body
LE: loop exit
PB: predicated region body
PF: predicated region fallthrough
CT: control target
= control target key end

     0   :  { %vm30_vm0 = vcmask 261120   ;;  %vm188_vm1 = vcmask 523264   ;;  %s497_s0 = inlined_call_operand.vmem [shape: f32[16,32], index: 0, kind: input, shape index: {}]   ;;  %s498_s3 = inlined_call_operand.vmem [shape: f32[32,64], index: 3, kind: input, shape index: {}]   ;;  %s499_s1 = inlined_call_operand.vmem [shape: f32[1,32], index: 1, kind: input, shape index: {}]   ;;  %s500_s2 = inlined_call_operand.vmem [shape: f32[1,32], index: 2, kind: input, shape index: {}]   ;;  %s501_s5 = inlined_call_operand.vmem [shape: f32[64,32], index: 5, kind: input, shape index: {}]   ;;  %s502_s4 = inlined_call_operand.vmem [shape: f32[1,64], index: 4, kind: input, shape index: {}]   ;;  %s503_s6 = inlined_call_operand.vmem [shape: f32[1,32], index: 6, kind: input, shape index: {}]   ;;  %s504_s7 = inlined_call_operand.vmem [shape: f32[16,32], index: 7, kind: output, shape index: {}]  }
   0x1   :  { %v422_v0 = vld [vmem:[%s497_s0] sm:$0xff]  ;;  %v427_v1 = vld [vmem:[%s497_s0 + $0x8] sm:$0xff]  ;;  %v76_v16 = vld [vmem:[%s498_s3 + $0x10] sm:$0xff] }
   0x2   :  { %v31_v2 = vsel %vm30_vm0, %v422_v0, 0.0  ;;  %v34_v3 = vsel %vm30_vm0, %v427_v1, 0.0  ;;  %v74_v14 = vld [vmem:[%s498_s3] sm:$0xff]  ;;  %v75_v15 = vld [vmem:[%s498_s3 + $0x8] sm:$0xff]  ;;  %v77_v18 = vld [vmem:[%s498_s3 + $0x18] sm:$0xff] }
   0x3   :  { %32 = vadd.xlane.f32.xlu0 %v31_v2  ;;  %v343_v17 = vpack.c.bf16 %v75_v15, %v74_v14  ;;  %v347_v19 = vpack.c.bf16 %v77_v18, %v76_v16  ;;  %v287_v27 = vld [vmem:[%s499_s1] ss:$0 sm:$0xff]  ;;  %v181_v37 = vld [vmem:[%s501_s5 + $0x8] sm:$0xff]  ;;  %v182_v39 = vld [vmem:[%s501_s5 + $0x10] sm:$0xff] }
   0x4   :  { %v288_v29 = vld [vmem:[%s500_s2] ss:$0 sm:$0xff]  ;;  %v183_v40 = vld [vmem:[%s501_s5 + $0x18] sm:$0xff]  ;;  %v185_v43 = vld [vmem:[%s501_s5 + $0x28] sm:$0xff] }
   0x5   :  { %344 = vmatprep.subr.bf16.mxu0 %v343_v17  ;;  %v180_v36 = vld [vmem:[%s501_s5] sm:$0xff]  ;;  %v355_v41 = vpack.c.bf16 %v183_v40, %v182_v39  ;;  %v186_v45 = vld [vmem:[%s501_s5 + $0x30] sm:$0xff]  ;;  %v187_v46 = vld [vmem:[%s501_s5 + $0x38] sm:$0xff] }
   0x6   :  { %346 = vmatpush3.bf16.msra.mxu0 %v343_v17  ;;  %v351_v38 = vpack.c.bf16 %v181_v37, %v180_v36  ;;  %v184_v42 = vld [vmem:[%s501_s5 + $0x20] sm:$0xff]  ;;  %v363_v47 = vpack.c.bf16 %v187_v46, %v186_v45 }
   0x7   :  { %35 = vadd.xlane.f32.xlu0 %v34_v3  ;;  %348 = vmatprep.subr.bf16.mxu0 %v347_v19  ;;  %v359_v44 = vpack.c.bf16 %v185_v43, %v184_v42  ;;  %v289_v48 = vld [vmem:[%s502_s4] ss:$0 sm:$0xff] }
   0x8   :  { %352 = vmatprep.subr.bf16.mxu1 %v351_v38  ;;  %v296_v2 = vld [vmem:[%s503_s6] ss:$0 sm:$0xff] }
   0x9   :  { %354 = vmatpush3.bf16.msra.mxu1 %v351_v38 }
   0xa   :  { %350 = vmatpush3.bf16.msra.mxu0 %v347_v19  ;;  %356 = vmatprep.subr.bf16.mxu1 %v355_v41 }
   0xd   :  { %358 = vmatpush3.bf16.msra.mxu1 %v355_v41 }
   0xe   :  { %360 = vmatprep.subr.bf16.mxu1 %v359_v44 }
  0x11   :  { %362 = vmatpush3.bf16.msra.mxu1 %v359_v44 }
  0x12   :  { %364 = vmatprep.subr.bf16.mxu1 %v363_v47 }
  0x15   :  { %366 = vmatpush3.bf16.msra.mxu1 %v363_v47 }
  0x90   :  { %v33_v4 = vpop.xlane.xlu0 %32 }
  0x91   :  { %v38_v5 = vmul.f32 0.03125, %v33_v4 }
  0x93   :  { %v40_v6 = vsub.f32 %v422_v0, %v38_v5 }
  0x94   :  { %v36_v7 = vpop.xlane.xlu0 %35 }
  0x95   :  { %v39_v8 = vmul.f32 0.03125, %v36_v7  ;;  %v42_v9 = vmul.f32 %v40_v6, %v40_v6 }
  0x97   :  { %v41_v10 = vsub.f32 %v427_v1, %v39_v8  ;;  %v44_v11 = vsel %vm30_vm0, %v42_v9, 0.0 }
  0x98   :  { %45 = vadd.xlane.f32.xlu1 %v44_v11 }
  0x99   :  { %v43_v12 = vmul.f32 %v41_v10, %v41_v10 }
  0x9b   :  { %v47_v13 = vsel %vm30_vm0, %v43_v12, 0.0 }
  0x9c   :  { %48 = vadd.xlane.f32.xlu1 %v47_v13 }
 0x125   :  { %v46_v20 = vpop.xlane.xlu1 %45 }
 0x126   :  { %v50_v21 = vmul.f32 0.03125, %v46_v20 }
 0x128   :  { %v52_v22 = vadd.f32 1e-05, %v50_v21 }
 0x129   :  { %v49_v23 = vpop.xlane.xlu1 %48 }
 0x12a   :  { %367 = vrsqrt.f32 %v52_v22  ;;  %v51_v24 = vmul.f32 0.03125, %v49_v23 }
 0x12c   :  { %v53_v25 = vadd.f32 1e-05, %v51_v24 }
 0x12e   :  { %369 = vrsqrt.f32 %v53_v25 }
 0x134   :  { %v368_v26 = vpop.eup %367 }
 0x135   :  { %v56_v28 = vmul.f32 %v368_v26, %v40_v6 }
 0x137   :  { %v64_v30 = vmul.f32 %v287_v27, %v56_v28 }
 0x138   :  { %v370_v31 = vpop.eup %369 }
 0x139   :  { %v57_v32 = vmul.f32 %v370_v31, %v41_v10  ;;  %v72_v33 = vadd.f32 %v288_v29, %v64_v30 }
 0x13b   :  { %v65_v34 = vmul.f32 %v287_v27, %v57_v32  ;;  %321 = vmatprep.mubr.msk.f32.mxu0 %vm30_vm0, %v72_v33 }
 0x13d   :  { %v73_v35 = vadd.f32 %v288_v29, %v65_v34 }
 0x13f   :  { %322 = vmatmul.mubr.msk.f32.vlgmr.msra.gmra.mrb[0].mxu0 %vm30_vm0, %v73_v35 }
 0x212   :  { %v323_v49 = vpop.f32.mrb[0].mxu0 }
 0x213   :  { %v163_v50 = vadd.f32 %v323_v49, %v289_v48  ;;  %v157_v51 = vpop.f32.mrb[1].mxu0 }
 0x214   :  { %v158_v52 = vadd.f32 %v289_v48, %v157_v51 }
 0x215   :  { %v293_v53 = vmul.f32 -1.442695, %v163_v50 }
 0x216   :  { %v292_v54 = vmul.f32 -1.442695, %v158_v52 }
 0x217   :  { %371 = vpow2.f32 %v293_v53 }
 0x218   :  { %373 = vpow2.f32 %v292_v54 }
 0x221   :  { %v372_v55 = vpop.eup %371 }
 0x222   :  { %v374_v56 = vpop.eup %373  ;;  %v173_v57 = vadd.f32 1.0, %v372_v55 }
 0x223   :  { %v172_v58 = vadd.f32 1.0, %v374_v56 }
 0x224   :  { %375 = vrcp.f32 %v173_v57 }
 0x225   :  { %377 = vrcp.f32 %v172_v58 }
 0x22e   :  { %v376_v59 = vpop.eup %375 }
 0x22f   :  { %v378_v60 = vpop.eup %377  ;;  %v179_v62 = vmul.f32 %v376_v59, %v163_v50 }
 0x230   :  { %v178_v61 = vmul.f32 %v378_v60, %v158_v52 }
 0x232   :  { %340 = vmatprep.mubr.msk.f32.mxu1 %vm188_vm1, %v178_v61 }
 0x233   :  { %341 = vmatmul.mubr.msk.f32.vlgmr.msra.gmra.mrb[0].mxu1 %vm188_vm1, %v179_v62 }
 0x306   :  { %v342_v63 = vpop.f32.mrb[0].mxu1 }
 0x307   :  { %v271_v3 = vadd.f32 %v342_v63, %v427_v1  ;;  %v261_v4 = vpop.f32.mrb[1].mxu1 }
 0x308   :  { %v270_v5 = vadd.f32 %v261_v4, %v422_v0 }
 0x309   :  { %v280_v6 = vadd.f32 %v296_v2, %v271_v3 }
 0x30a   :  { %v279_v7 = vadd.f32 %v296_v2, %v270_v5 }
 0x30b   :  { %282 = vst.msk [vmem:[%s504_s7 + $0x8] sm:$0xff] %vm30_vm0, %v280_v6 }
 0x30c   :  { %281 = vst.msk [vmem:[%s504_s7] sm:$0xff] %vm30_vm0, %v279_v7 }

// kernel: encoder_ssm.21
= control target key start
LH: loop header
LB: loop body
LE: loop exit
PB: predicated region body
PF: predicated region fallthrough
CT: control target
= control target key end

     0   :  { %vm31_vm0 = vcmask 261120   ;;  %s546_s0 = inlined_call_operand.vmem [shape: f32[16,32], index: 0, kind: input, shape index: {}]   ;;  %s547_s1 = inlined_call_operand.vmem [shape: f32[1,32], index: 1, kind: input, shape index: {}]   ;;  %s548_s2 = inlined_call_operand.vmem [shape: f32[1,32], index: 2, kind: input, shape index: {}]   ;;  %s549_s3 = inlined_call_operand.vmem [shape: f32[32,64], index: 3, kind: input, shape index: {}]   ;;  %s550_s4 = inlined_call_operand.vmem [shape: f32[1,64], index: 4, kind: input, shape index: {}]   ;;  %s551_s5 = inlined_call_operand.vmem [shape: f32[64,32], index: 5, kind: input, shape index: {}]   ;;  %s552_s6 = inlined_call_operand.vmem [shape: f32[1,32], index: 6, kind: input, shape index: {}]   ;;  %s553_s7 = inlined_call_operand.hbm [shape: f32[16,32], index: 7, kind: output, shape index: {}]  }
   0x1   :  { %v465_v0 = vld [vmem:[%s546_s0] sm:$0xff]  ;;  %v470_v1 = vld [vmem:[%s546_s0 + $0x8] sm:$0xff] }
   0x2   :  { %12 = vsyncpa [#allocation3], 0  ;;  %v32_v2 = vsel %vm31_vm0, %v465_v0, 0.0  ;;  %v35_v3 = vsel %vm31_vm0, %v470_v1, 0.0  ;;  %v75_v14 = vld [vmem:[%s549_s3] sm:$0xff]  ;;  %v76_v15 = vld [vmem:[%s549_s3 + $0x8] sm:$0xff] }
   0x3   :  { %33 = vadd.xlane.f32.xlu0 %v32_v2  ;;  %v77_v16 = vld [vmem:[%s549_s3 + $0x10] sm:$0xff]  ;;  %v356_v17 = vpack.c.bf16 %v76_v15, %v75_v14  ;;  %v78_v18 = vld [vmem:[%s549_s3 + $0x18] sm:$0xff]  ;;  %v300_v27 = vld [vmem:[%s547_s1] ss:$0 sm:$0xff]  ;;  %vm189_vm1 = vcmask 523264   ;;  %s419_s30 = smov [#allocation2]  }
   0x4   :  { %v360_v19 = vpack.c.bf16 %v78_v18, %v77_v16  ;;  %v301_v29 = vld [vmem:[%s548_s2] ss:$0 sm:$0xff]  ;;  %v182_v37 = vld [vmem:[%s551_s5 + $0x8] sm:$0xff]  ;;  %v183_v39 = vld [vmem:[%s551_s5 + $0x10] sm:$0xff]  ;;  %s289_s8 = sshll.u32 %s419_s30, 4  ;;  %s290_s8 = int_to_ptr.vmem [resolvable:$true] %s289_s8 }
   0x5   :  { %357 = vmatprep.subr.bf16.mxu0 %v356_v17  ;;  %v181_v36 = vld [vmem:[%s551_s5] sm:$0xff]  ;;  %v184_v40 = vld [vmem:[%s551_s5 + $0x18] sm:$0xff]  ;;  %v186_v43 = vld [vmem:[%s551_s5 + $0x28] sm:$0xff]  ;;  %s395_s9 = scalar_lea.vmem %s290_s8, 256  ;;  %p400_p1 = scmp.lt.s32.totalorder %s290_s8, %s290_s8 }
   0x6   :  { %359 = vmatpush3.bf16.msra.mxu0 %v356_v17  ;;  %v364_v38 = vpack.c.bf16 %v182_v37, %v181_v36  ;;  %v368_v41 = vpack.c.bf16 %v184_v40, %v183_v39  ;;  %v185_v42 = vld [vmem:[%s551_s5 + $0x20] sm:$0xff]  ;;  %v187_v45 = vld [vmem:[%s551_s5 + $0x30] sm:$0xff]  ;;  %v188_v46 = vld [vmem:[%s551_s5 + $0x38] sm:$0xff]  ;;  %p396_p0 = scmp.ne.s32.totalorder %s290_s8, %s395_s9  ;;  %p401_p2 = scmp.lt.s32.totalorder %s395_s9, %s395_s9 }
   0x7   :  { %36 = vadd.xlane.f32.xlu0 %v35_v3  ;;  %361 = vmatprep.subr.bf16.mxu0 %v360_v19  ;;  %v372_v44 = vpack.c.bf16 %v186_v43, %v185_v42  ;;  %v376_v47 = vpack.c.bf16 %v188_v46, %v187_v45  ;;  %v302_v48 = vld [vmem:[%s550_s4] ss:$0 sm:$0xff] }
   0x8   :  { %365 = vmatprep.subr.bf16.mxu1 %v364_v38  ;;  %v309_v2 = vld [vmem:[%s552_s6] ss:$0 sm:$0xff]  ;;  %p402_p3 = por %p401_p2, %p400_p1 }
   0x9   :  { %367 = vmatpush3.bf16.msra.mxu1 %v364_v38 }
   0xa   :  { %363 = vmatpush3.bf16.msra.mxu0 %v360_v19  ;;  %369 = vmatprep.subr.bf16.mxu1 %v368_v41  ;;  %p403_p4 = pnand %p402_p3, %p396_p0 }
   0xd   :  { %371 = vmatpush3.bf16.msra.mxu1 %v368_v41 }
   0xe   :  { %373 = vmatprep.subr.bf16.mxu1 %v372_v44 }
  0x11   :  { %375 = vmatpush3.bf16.msra.mxu1 %v372_v44 }
  0x12   :  { %377 = vmatprep.subr.bf16.mxu1 %v376_v47 }
  0x15   :  { %379 = vmatpush3.bf16.msra.mxu1 %v376_v47 }
  0x90   :  { %v34_v4 = vpop.xlane.xlu0 %33 }
  0x91   :  { %v39_v5 = vmul.f32 0.03125, %v34_v4 }
  0x93   :  { %v41_v6 = vsub.f32 %v465_v0, %v39_v5 }
  0x94   :  { %v37_v7 = vpop.xlane.xlu0 %36 }
  0x95   :  { %v40_v8 = vmul.f32 0.03125, %v37_v7  ;;  %v43_v9 = vmul.f32 %v41_v6, %v41_v6 }
  0x97   :  { %v42_v10 = vsub.f32 %v470_v1, %v40_v8  ;;  %v45_v11 = vsel %vm31_vm0, %v43_v9, 0.0 }
  0x98   :  { %46 = vadd.xlane.f32.xlu1 %v45_v11 }
  0x99   :  { %v44_v12 = vmul.f32 %v42_v10, %v42_v10 }
  0x9b   :  { %v48_v13 = vsel %vm31_vm0, %v44_v12, 0.0 }
  0x9c   :  { %49 = vadd.xlane.f32.xlu1 %v48_v13 }
 0x125   :  { %v47_v20 = vpop.xlane.xlu1 %46 }
 0x126   :  { %v51_v21 = vmul.f32 0.03125, %v47_v20 }
 0x128   :  { %v53_v22 = vadd.f32 1e-05, %v51_v21 }
 0x129   :  { %v50_v23 = vpop.xlane.xlu1 %49 }
 0x12a   :  { %383 = vrsqrt.f32 %v53_v22  ;;  %v52_v24 = vmul.f32 0.03125, %v50_v23 }
 0x12c   :  { %v54_v25 = vadd.f32 1e-05, %v52_v24 }
 0x12e   :  { %385 = vrsqrt.f32 %v54_v25 }
 0x134   :  { %v384_v26 = vpop.eup %383 }
 0x135   :  { %v57_v28 = vmul.f32 %v384_v26, %v41_v6 }
 0x137   :  { %v65_v30 = vmul.f32 %v300_v27, %v57_v28 }
 0x138   :  { %v386_v31 = vpop.eup %385 }
 0x139   :  { %v58_v32 = vmul.f32 %v386_v31, %v42_v10  ;;  %v73_v33 = vadd.f32 %v301_v29, %v65_v30 }
 0x13b   :  { %v66_v34 = vmul.f32 %v300_v27, %v58_v32  ;;  %334 = vmatprep.mubr.msk.f32.mxu0 %vm31_vm0, %v73_v33 }
 0x13d   :  { %v74_v35 = vadd.f32 %v301_v29, %v66_v34 }
 0x13f   :  { %335 = vmatmul.mubr.msk.f32.vlgmr.msra.gmra.mrb[0].mxu0 %vm31_vm0, %v74_v35 }
 0x212   :  { %v336_v49 = vpop.f32.mrb[0].mxu0 }
 0x213   :  { %v164_v50 = vadd.f32 %v336_v49, %v302_v48  ;;  %v158_v51 = vpop.f32.mrb[1].mxu0 }
 0x214   :  { %v159_v52 = vadd.f32 %v302_v48, %v158_v51 }
 0x215   :  { %v306_v53 = vmul.f32 -1.442695, %v164_v50 }
 0x216   :  { %v305_v54 = vmul.f32 -1.442695, %v159_v52 }
 0x217   :  { %387 = vpow2.f32 %v306_v53 }
 0x218   :  { %389 = vpow2.f32 %v305_v54 }
 0x221   :  { %v388_v55 = vpop.eup %387 }
 0x222   :  { %v390_v56 = vpop.eup %389  ;;  %v174_v57 = vadd.f32 1.0, %v388_v55 }
 0x223   :  { %v173_v58 = vadd.f32 1.0, %v390_v56 }
 0x224   :  { %391 = vrcp.f32 %v174_v57 }
 0x225   :  { %393 = vrcp.f32 %v173_v58 }
 0x22e   :  { %v392_v59 = vpop.eup %391 }
 0x22f   :  { %v394_v60 = vpop.eup %393  ;;  %v180_v62 = vmul.f32 %v392_v59, %v164_v50 }
 0x230   :  { %v179_v61 = vmul.f32 %v394_v60, %v159_v52 }
 0x232   :  { %353 = vmatprep.mubr.msk.f32.mxu1 %vm189_vm1, %v179_v61 }
 0x233   :  { %354 = vmatmul.mubr.msk.f32.vlgmr.msra.gmra.mrb[0].mxu1 %vm189_vm1, %v180_v62 }
 0x306   :  { %v355_v63 = vpop.f32.mrb[0].mxu1 }
 0x307   :  { %v272_v3 = vadd.f32 %v355_v63, %v470_v1  ;;  %v262_v4 = vpop.f32.mrb[1].mxu1 }
 0x308   :  { %v271_v5 = vadd.f32 %v262_v4, %v465_v0 }
 0x309   :  { %v281_v6 = vadd.f32 %v309_v2, %v272_v3 }
 0x30a   :  { %v280_v7 = vadd.f32 %v309_v2, %v271_v5 }
 0x30b   :  { %283 = vst.msk [vmem:[#allocation2 + $0x8] sm:$0xff] %vm31_vm0, %v281_v6 }
 0x30c   :  { %282 = vst.msk [vmem:[#allocation2] sm:$0xff] %vm31_vm0, %v280_v7 }
 0x30d   :  { %406 = shalt.err (!%p403_p4)
}
 0x30e   :  { %s407_s11 = scalar_lea.hbm %s553_s7, 256 }
 0x30f   :  { %p408_p5 = scmp.ne.s32.totalorder %s553_s7, %s407_s11  ;;  %p411_p6 = scmp.lt.u32.totalorder %s407_s11, %s553_s7 }
 0x311   :  { %p413_p7 = pnand %p411_p6, %p408_p5 }
 0x313   :  { %416 = shalt.err (!%p413_p7)
}
 0x314   :  { %s420_s15 = smov 128   ;;  %s421_s16 = smov 8  }
 0x315   :  { %295 = dma.vmem_to_hbm [thread:$0]  %s290_s8, 256, %s553_s7, [#allocation3], %s420_s15, %s420_s15, %s421_s16  }
 0x316   :  { %417 = dma.done.wait [#allocation3], 256  }
 0x317   :  { %418 = vsyncadd [#allocation3], 4294967040 }
 0x318   :  { %299 = vsyncpa [#allocation3], 1 }

</bundles_post_ra>
